<compile_context>
chip_gen: v6e
topology: v6e:2x2x1
jax: 0.10.0
libtpu: 0.0.40
codegen_flags: <defaults>
</compile_context>

<pallas_src>
import functools

import jax
import jax.numpy as jnp
from jax.experimental import pallas as pl
from jax.experimental.pallas import tpu as pltpu


def _cross_attention_kernel(q_ref, kv_ref, mask_ref, wq_t_ref, wkv_t_ref, wp_t_ref,
                            bp_ref, o_ref, *, num_heads, head_dim):
    H, hd = num_heads, head_dim
    C = H * hd
    QR = q_ref.shape[0]    # B * QN   (query rows, batch folded)
    KR = kv_ref.shape[0]   # B * N    (key/value rows, batch folded)

    q2 = q_ref[...]        # (QR, C)
    kv2 = kv_ref[...]      # (KR, C)

    # --- Projections. Scale is folded into W_q^T; K/V share one fused, lane-dense matmul.
    # NOTE: at production C, cast operands to bf16 here (keep f32 accumulation).
    qp = jnp.dot(q2, wq_t_ref[...], preferred_element_type=jnp.float32)       # (QR, C)
    kvp = jnp.dot(kv2, wkv_t_ref[...], preferred_element_type=jnp.float32)    # (KR, 2C)
    k = kvp[:, :C]                                                            # (KR, C)
    v = kvp[:, C:]                                                            # (KR, C)

    # --- Head split: one einshape per tensor, heads become the single batch dim. ---
    qh = pltpu.einshape("qhd->hqd", qp.reshape(QR, H, hd))    # (H, QR, hd)
    kh = pltpu.einshape("khd->hkd", k.reshape(KR, H, hd))     # (H, KR, hd)
    vh = pltpu.einshape("khd->hkd", v.reshape(KR, H, hd))     # (H, KR, hd)

    # --- Scores for all heads in one batched contraction (batch packed into key axis). ---
    s = jnp.einsum("hqd,hkd->hqk", qh, kh, preferred_element_type=jnp.float32)  # (H, QR, KR)
    # Host-built additive mask: key_mask on same-batch blocks, -1e30 on cross-batch blocks.
    s = s + mask_ref[...][None]

    # --- Numerically stable, exact softmax over keys. ---
    s = s - jnp.max(s, axis=-1, keepdims=True)
    p = jnp.exp(s)
    p = p / jnp.sum(p, axis=-1, keepdims=True)

    # --- Attention @ V, head merge, output projection. ---
    ctx = jnp.einsum("hqk,hkd->hqd", p, vh, preferred_element_type=jnp.float32)  # (H, QR, hd)
    x = pltpu.einshape("hqd->qhd", ctx).reshape(QR, C)                            # (QR, C)

    out = jnp.dot(x, wp_t_ref[...], preferred_element_type=jnp.float32) + bp_ref[...]
    o_ref[...] = out.astype(o_ref.dtype)


def prepare_weights(w_q, w_kv, w_proj, b_proj, *, num_heads=8, qk_scale=None):
    """One-time (param-load-time) weight prep: transposes, K/V fusion, scale folding."""
    C = w_q.shape[0]
    hd = C // num_heads
    scale = float(qk_scale) if qk_scale is not None else hd ** (-0.5)
    return dict(
        wq_t=(w_q.T * scale).astype(jnp.float32),   # (C, C), softmax scale folded in
        wkv_t=w_kv.T.astype(jnp.float32),           # (C, 2C), fused K/V projection
        wp_t=w_proj.T.astype(jnp.float32),          # (C, C)
        bp=b_proj.reshape(1, C).astype(jnp.float32),
    )


def cross_attention(q, kv, key_mask, weights, *, num_heads=8):
    B, QN, C = q.shape
    _, N, _ = kv.shape
    hd = C // num_heads

    q2 = q.reshape(B * QN, C)
    kv2 = kv.reshape(B * N, C)

    # Host-side packed additive mask (B*QN, B*N): same-batch blocks carry key_mask,
    # cross-batch blocks are -1e30 (exp underflows to exactly 0 after the row-max shift).
    km = (key_mask.astype(jnp.float32) if key_mask is not None
          else jnp.zeros((B, QN, N), jnp.float32))
    same_batch = jnp.arange(B)[:, None] == jnp.arange(B)[None, :]          # (B, B)
    mask_full = jnp.where(same_batch[:, None, :, None],
                          jnp.broadcast_to(km[:, :, None, :], (B, QN, B, N)),
                          jnp.float32(-1e30)).reshape(B * QN, B * N)

    kernel = functools.partial(_cross_attention_kernel, num_heads=num_heads, head_dim=hd)

    # Grid-less launch: everything (a few KiB) is VMEM-resident for a single invocation,
    # so no grid-loop prologue and no pointless input double-buffering.
    out = pl.pallas_call(
        kernel,
        out_shape=jax.ShapeDtypeStruct((B * QN, C), q.dtype),
        in_specs=[pl.BlockSpec(memory_space=pltpu.MemorySpace.VMEM)] * 7,
        out_specs=pl.BlockSpec(memory_space=pltpu.MemorySpace.VMEM),
    )(q2, kv2, mask_full, weights["wq_t"], weights["wkv_t"], weights["wp_t"], weights["bp"])

    return out.reshape(B, QN, C)


def _reference(q, kv, key_mask, w_q, w_kv, w_proj, b_proj, *, num_heads=8):
    """Pure-JAX mirror of the PyTorch forward, for correctness checking."""
    B, QN, C = q.shape
    N = kv.shape[1]
    hd = C // num_heads
    scale = hd ** (-0.5)
    qp = (q @ w_q.T).reshape(B, QN, num_heads, hd).transpose(0, 2, 1, 3) * scale
    kvp = (kv @ w_kv.T).reshape(B, N, 2, num_heads, hd).transpose(2, 0, 3, 1, 4)
    k, v = kvp[0], kvp[1]
    attn = jnp.einsum('bhqd,bhkd->bhqk', qp, k)
    if key_mask is not None:
        attn = attn + key_mask[:, None]
    attn = jax.nn.softmax(attn, axis=-1)
    x = jnp.einsum('bhqk,bhkd->bhqd', attn, v).transpose(0, 2, 1, 3).reshape(B, QN, C)
    return x @ w_proj.T + b_proj


if __name__ == "__main__":
    # Small shapes consistent with the module: dim=64, num_heads=8 (head_dim=8)
    B, QN, N, C, H = 2, 8, 16, 64, 8

    key = jax.random.PRNGKey(0)
    k1, k2, k3, k4, k5, k6 = jax.random.split(key, 6)

    q = jax.random.normal(k1, (B, QN, C), dtype=jnp.float32)
    kv = jax.random.normal(k2, (B, N, C), dtype=jnp.float32)
    # additive key mask (0 / large-negative); finite values keep the test stable
    key_mask = jnp.where(jax.random.uniform(k3, (B, QN, N)) > 0.8, -1e4, 0.0).astype(jnp.float32)

    # Deterministic parameter init (trunc_normal-ish scale, zero proj bias like the module)
    w_q = 0.02 * jax.random.normal(k4, (C, C), dtype=jnp.float32)
    w_kv = 0.02 * jax.random.normal(k5, (2 * C, C), dtype=jnp.float32)
    w_proj = 0.02 * jax.random.normal(k6, (C, C), dtype=jnp.float32)
    b_proj = jnp.zeros((C,), dtype=jnp.float32)

    weights = prepare_weights(w_q, w_kv, w_proj, b_proj, num_heads=H)

    out = cross_attention(q, kv, key_mask, weights, num_heads=H)
    out = jax.block_until_ready(out)

    ref = _reference(q, kv, key_mask, w_q, w_kv, w_proj, b_proj, num_heads=H)
    assert out.shape == (B, QN, C)
    # exact softmax now; tolerance only covers MXU accumulation-order differences
    assert jnp.allclose(out, ref, atol=1e-4, rtol=1e-4), "Pallas kernel mismatch vs JAX reference"

    print("KERNEL_OK")
</pallas_src>

<mosaic_0001>
module attributes {stable_mosaic.version = 11 : i64} {
  func.func @_cross_attention_kernel(%arg0: memref<16x64xf32, #tpu.memory_space<vmem>>, %arg1: memref<32x64xf32, #tpu.memory_space<vmem>>, %arg2: memref<16x32xf32, #tpu.memory_space<vmem>>, %arg3: memref<64x64xf32, #tpu.memory_space<vmem>>, %arg4: memref<64x128xf32, #tpu.memory_space<vmem>>, %arg5: memref<64x64xf32, #tpu.memory_space<vmem>>, %arg6: memref<1x64xf32, #tpu.memory_space<vmem>>, %arg7: memref<16x64xf32, #tpu.memory_space<vmem>>) attributes {dimension_semantics = [], scalar_prefetch = 0 : i64, scratch_operands = 0 : i64, tpu.core_type = #tpu.core_type<tc>} {
    %c0 = arith.constant 0 : index
    %c0_0 = arith.constant 0 : index
    %0 = vector.load %arg0[%c0, %c0_0] : memref<16x64xf32, #tpu.memory_space<vmem>>, vector<16x64xf32>
    %c0_1 = arith.constant 0 : index
    %c0_2 = arith.constant 0 : index
    %1 = vector.load %arg1[%c0_1, %c0_2] : memref<32x64xf32, #tpu.memory_space<vmem>>, vector<32x64xf32>
    %c0_3 = arith.constant 0 : index
    %c0_4 = arith.constant 0 : index
    %2 = vector.load %arg3[%c0_3, %c0_4] : memref<64x64xf32, #tpu.memory_space<vmem>>, vector<64x64xf32>
    %cst = arith.constant dense<0.000000e+00> : vector<16x64xf32>
    %3 = tpu.matmul %0, %2, %cst {dimension_numbers = #tpu.dot_dimension_numbers<[1], [0], [0], [1], [0, 0, 1, 1], [], []>} : vector<16x64xf32>, vector<64x64xf32>, vector<16x64xf32> -> vector<16x64xf32>
    %c0_5 = arith.constant 0 : index
    %c0_6 = arith.constant 0 : index
    %4 = vector.load %arg4[%c0_5, %c0_6] : memref<64x128xf32, #tpu.memory_space<vmem>>, vector<64x128xf32>
    %cst_7 = arith.constant dense<0.000000e+00> : vector<32x128xf32>
    %5 = tpu.matmul %1, %4, %cst_7 {dimension_numbers = #tpu.dot_dimension_numbers<[1], [0], [0], [1], [0, 0, 1, 1], [], []>} : vector<32x64xf32>, vector<64x128xf32>, vector<32x128xf32> -> vector<32x128xf32>
    %6 = vector.extract_strided_slice %5 {offsets = [0, 0], sizes = [32, 64], strides = [1, 1]} : vector<32x128xf32> to vector<32x64xf32>
    %7 = vector.extract_strided_slice %5 {offsets = [0, 64], sizes = [32, 64], strides = [1, 1]} : vector<32x128xf32> to vector<32x64xf32>
    %8 = vector.shape_cast %3 : vector<16x64xf32> to vector<16x8x8xf32>
    %9 = tpu.transpose %8, [1, 0, 2] : vector<16x8x8xf32> -> vector<8x16x8xf32>
    %10 = vector.shape_cast %6 : vector<32x64xf32> to vector<32x8x8xf32>
    %11 = tpu.transpose %10, [1, 0, 2] : vector<32x8x8xf32> -> vector<8x32x8xf32>
    %12 = vector.shape_cast %7 : vector<32x64xf32> to vector<32x8x8xf32>
    %13 = tpu.transpose %12, [1, 0, 2] : vector<32x8x8xf32> -> vector<8x32x8xf32>
    "tpu.trace_start"() <{level = 10 : i32, message = "hqd,hkd->hqk"}> : () -> ()
    %cst_8 = arith.constant dense<0.000000e+00> : vector<8x16x32xf32>
    %14 = tpu.matmul %9, %11, %cst_8 {dimension_numbers = #tpu.dot_dimension_numbers<[2], [2], [1], [1], [0, 0, 0, 1, 1, 1], [0], [0]>} : vector<8x16x8xf32>, vector<8x32x8xf32>, vector<8x16x32xf32> -> vector<8x16x32xf32>
    "tpu.trace_stop"() : () -> ()
    %c0_9 = arith.constant 0 : index
    %c0_10 = arith.constant 0 : index
    %15 = vector.load %arg2[%c0_9, %c0_10] : memref<16x32xf32, #tpu.memory_space<vmem>>, vector<16x32xf32>
    %16 = vector.shape_cast %15 : vector<16x32xf32> to vector<1x16x32xf32>
    %17 = vector.broadcast %16 : vector<1x16x32xf32> to vector<8x16x32xf32>
    %18 = arith.addf %14, %17 : vector<8x16x32xf32>
    %cst_11 = arith.constant dense<0xFF800000> : vector<8x16xf32>
    %19 = vector.multi_reduction <maximumf>, %18, %cst_11 [2] : vector<8x16x32xf32> to vector<8x16xf32>
    %20 = vector.shape_cast %19 : vector<8x16xf32> to vector<8x16x1xf32>
    %21 = vector.broadcast %20 : vector<8x16x1xf32> to vector<8x16x32xf32>
    %22 = arith.subf %18, %21 : vector<8x16x32xf32>
    %23 = math.exp %22 : vector<8x16x32xf32>
    %cst_12 = arith.constant dense<0.000000e+00> : vector<8x16xf32>
    %24 = vector.multi_reduction <add>, %23, %cst_12 [2] : vector<8x16x32xf32> to vector<8x16xf32>
    %25 = vector.shape_cast %24 : vector<8x16xf32> to vector<8x16x1xf32>
    %26 = vector.broadcast %25 : vector<8x16x1xf32> to vector<8x16x32xf32>
    %27 = arith.divf %23, %26 : vector<8x16x32xf32>
    "tpu.trace_start"() <{level = 10 : i32, message = "hqk,hkd->hqd"}> : () -> ()
    %cst_13 = arith.constant dense<0.000000e+00> : vector<8x16x8xf32>
    %28 = tpu.matmul %27, %13, %cst_13 {dimension_numbers = #tpu.dot_dimension_numbers<[2], [1], [1], [2], [0, 0, 0, 1, 1, 2], [0], [0]>} : vector<8x16x32xf32>, vector<8x32x8xf32>, vector<8x16x8xf32> -> vector<8x16x8xf32>
    "tpu.trace_stop"() : () -> ()
    %29 = tpu.transpose %28, [1, 0, 2] : vector<8x16x8xf32> -> vector<16x8x8xf32>
    %30 = vector.shape_cast %29 : vector<16x8x8xf32> to vector<16x64xf32>
    %c0_14 = arith.constant 0 : index
    %c0_15 = arith.constant 0 : index
    %31 = vector.load %arg5[%c0_14, %c0_15] : memref<64x64xf32, #tpu.memory_space<vmem>>, vector<64x64xf32>
    %cst_16 = arith.constant dense<0.000000e+00> : vector<16x64xf32>
    %32 = tpu.matmul %30, %31, %cst_16 {dimension_numbers = #tpu.dot_dimension_numbers<[1], [0], [0], [1], [0, 0, 1, 1], [], []>} : vector<16x64xf32>, vector<64x64xf32>, vector<16x64xf32> -> vector<16x64xf32>
    %c0_17 = arith.constant 0 : index
    %c0_18 = arith.constant 0 : index
    %33 = vector.load %arg6[%c0_17, %c0_18] : memref<1x64xf32, #tpu.memory_space<vmem>>, vector<1x64xf32>
    %34 = vector.broadcast %33 : vector<1x64xf32> to vector<16x64xf32>
    %35 = arith.addf %32, %34 : vector<16x64xf32>
    %c0_19 = arith.constant 0 : index
    %c0_20 = arith.constant 0 : index
    %36 = vector.load %arg7[%c0_19, %c0_20] : memref<16x64xf32, #tpu.memory_space<vmem>>, vector<16x64xf32>
    tpu.vector_store %arg7[%c0_19, %c0_20], %35 {strides = array<i32>} : memref<16x64xf32, #tpu.memory_space<vmem>>, vector<16x64xf32>,
    return
  }
}

</mosaic_0001>

<bundles_post_ra>
// kernel: tpu_custom_call.1
= control target key start
LH: loop header
LB: loop body
LE: loop exit
PB: predicated region body
PF: predicated region fallthrough
CT: control target
= control target key end

     0   :  { %12 = vsyncpa [#allocation3], 0  ;;  %s7859_s0 = inlined_call_operand.hbm [shape: f32[16,64], index: 0, kind: input, shape index: {}]   ;;  %s7860_s1 = inlined_call_operand.hbm [shape: f32[32,64], index: 1, kind: input, shape index: {}]   ;;  %s7861_s2 = inlined_call_operand.hbm [shape: f32[16,32], index: 2, kind: input, shape index: {}]   ;;  %s7862_s3 = inlined_call_operand.hbm [shape: f32[64,64], index: 3, kind: input, shape index: {}]   ;;  %s7863_s4 = inlined_call_operand.hbm [shape: f32[64,128], index: 4, kind: input, shape index: {}]   ;;  %s7864_s5 = inlined_call_operand.hbm [shape: f32[64,64], index: 5, kind: input, shape index: {}]   ;;  %s7865_s6 = inlined_call_operand.vmem [shape: f32[1,64], index: 6, kind: input, shape index: {}]   ;;  %s7866_s7 = inlined_call_operand.hbm [shape: f32[16,64], index: 7, kind: output, shape index: {}]  }
   0x1   :  { %13 = vsyncpa [#allocation6], 0 }
   0x2   :  { %14 = vsyncpa [#allocation9], 0 }
   0x3   :  { %15 = vsyncpa [#allocation12], 0 }
   0x4   :  { %16 = vsyncpa [#allocation4], 0  ;;  %s6339_s24 = smov [#allocation5]   ;;  %s6340_s26 = smov [#allocation8]  }
   0x5   :  { %s34_s25 = sshll.u32 %s6339_s24, 4  ;;  %s58_s27 = sshll.u32 %s6340_s26, 4  ;;  %s35_s25 = int_to_ptr.vmem [resolvable:$true] %s34_s25  ;;  %s59_s27 = int_to_ptr.vmem [resolvable:$true] %s58_s27 }
   0x6   :  { %s6197_s28 = scalar_lea.vmem %s35_s25, 512  ;;  %p6202_p1 = scmp.lt.s32.totalorder %s35_s25, %s35_s25 }
   0x7   :  { %p6198_p0 = scmp.ne.s32.totalorder %s35_s25, %s6197_s28  ;;  %p6203_p2 = scmp.lt.s32.totalorder %s6197_s28, %s6197_s28 }
   0x9   :  { %p6204_p3 = por %p6203_p2, %p6202_p1 }
   0xb   :  { %p6205_p4 = pnand %p6204_p3, %p6198_p0 }
   0xd   :  { %6208 = shalt.err (!%p6205_p4)
}
   0xe   :  { %s6341_s29 = smov 128   ;;  %s6342_s30 = smov 8  }
   0xf   :  { %40 = dma.hbm_to_vmem [thread:$0]  %s7860_s1, 512, %s35_s25, [#allocation6], %s6341_s29, %s6341_s29, %s6342_s30  }
  0x10   :  { %s6217_s10 = scalar_lea.vmem %s59_s27, 1024  ;;  %p6222_p6 = scmp.lt.s32.totalorder %s59_s27, %s59_s27 }
  0x11   :  { %p6218_p5 = scmp.ne.s32.totalorder %s59_s27, %s6217_s10  ;;  %p6223_p7 = scmp.lt.s32.totalorder %s6217_s10, %s6217_s10 }
  0x13   :  { %p6224_p8 = por %p6223_p7, %p6222_p6 }
  0x15   :  { %p6225_p9 = pnand %p6224_p8, %p6218_p5 }
  0x17   :  { %6228 = shalt.err (!%p6225_p9)
}
  0x18   :  { %64 = dma.hbm_to_vmem [thread:$0]  %s7862_s3, 1024, %s59_s27, [#allocation9], %s6341_s29, %s6341_s29, %s6342_s30  }
  0x19   :  { %s6343_s13 = smov [#allocation2]   ;;  %s6344_s15 = smov [#allocation7]  }
  0x1a   :  { %s22_s14 = sshll.u32 %s6343_s13, 4  ;;  %s46_s16 = sshll.u32 %s6344_s15, 4  ;;  %s23_s14 = int_to_ptr.vmem [resolvable:$true] %s22_s14  ;;  %s47_s16 = int_to_ptr.vmem [resolvable:$true] %s46_s16 }
  0x1b   :  { %s6237_s1 = scalar_lea.vmem %s23_s14, 256  ;;  %p6242_p11 = scmp.lt.s32.totalorder %s23_s14, %s23_s14 }
  0x1c   :  { %p6238_p10 = scmp.ne.s32.totalorder %s23_s14, %s6237_s1  ;;  %p6243_p12 = scmp.lt.s32.totalorder %s6237_s1, %s6237_s1 }
  0x1e   :  { %p6244_p13 = por %p6243_p12, %p6242_p11 }
  0x20   :  { %p6245_p0 = pnand %p6244_p13, %p6238_p10 }
  0x22   :  { %6248 = shalt.err (!%p6245_p0)
}
  0x23   :  { %28 = dma.hbm_to_vmem [thread:$0]  %s7859_s0, 256, %s23_s14, [#allocation3], %s6341_s29, %s6341_s29, %s6342_s30  }
  0x24   :  { %s6257_s3 = scalar_lea.vmem %s47_s16, 256  ;;  %p6262_p2 = scmp.lt.s32.totalorder %s47_s16, %s47_s16 }
  0x25   :  { %p6258_p1 = scmp.ne.s32.totalorder %s47_s16, %s6257_s3  ;;  %p6263_p3 = scmp.lt.s32.totalorder %s6257_s3, %s6257_s3 }
  0x27   :  { %p6264_p4 = por %p6263_p3, %p6262_p2 }
  0x29   :  { %p6265_p5 = pnand %p6264_p4, %p6258_p1 }
  0x2b   :  { %6268 = shalt.err (!%p6265_p5)
}
  0x2c   :  { %52 = dma.hbm_to_vmem [thread:$0]  %s7861_s2, 256, %s47_s16, [#allocation6], %s6341_s29, %s6341_s29, %s6342_s30  }
  0x2d   :  { %s6345_s21 = smov [#allocation10]   ;;  %s6346_s23 = smov [#allocation11]  }
  0x2e   :  { %s70_s22 = sshll.u32 %s6345_s21, 4  ;;  %s82_s24 = sshll.u32 %s6346_s23, 4  ;;  %s71_s22 = int_to_ptr.vmem [resolvable:$true] %s70_s22  ;;  %s83_s24 = int_to_ptr.vmem [resolvable:$true] %s82_s24 }
  0x2f   :  { %s6277_s0 = scalar_lea.vmem %s71_s22, 1024  ;;  %p6282_p7 = scmp.lt.s32.totalorder %s71_s22, %s71_s22 }
  0x30   :  { %p6278_p6 = scmp.ne.s32.totalorder %s71_s22, %s6277_s0  ;;  %p6283_p8 = scmp.lt.s32.totalorder %s6277_s0, %s6277_s0 }
  0x32   :  { %p6284_p9 = por %p6283_p8, %p6282_p7 }
  0x34   :  { %p6285_p10 = pnand %p6284_p9, %p6278_p6 }
  0x36   :  { %6288 = shalt.err (!%p6285_p10)
}
  0x37   :  { %76 = dma.hbm_to_vmem [thread:$0]  %s7863_s4, 1024, %s71_s22, [#allocation9], %s6341_s29, %s6341_s29, %s6342_s30  }
  0x38   :  { %s6297_s2 = scalar_lea.vmem %s83_s24, 1024  ;;  %p6302_p12 = scmp.lt.s32.totalorder %s83_s24, %s83_s24 }
  0x39   :  { %p6298_p11 = scmp.ne.s32.totalorder %s83_s24, %s6297_s2  ;;  %p6303_p13 = scmp.lt.s32.totalorder %s6297_s2, %s6297_s2 }
  0x3b   :  { %p6304_p0 = por %p6303_p13, %p6302_p12 }
  0x3d   :  { %p6305_p1 = pnand %p6304_p0, %p6298_p11 }
  0x3f   :  { %6308 = shalt.err (!%p6305_p1)
}
  0x40   :  { %88 = dma.hbm_to_vmem [thread:$0]  %s7864_s5, 1024, %s83_s24, [#allocation12], %s6341_s29, %s6341_s29, %s6342_s30  }
  0x41   :  { %6329 = dma.done.wait [#allocation3], 256  }
  0x42   :  { %6330 = vsyncadd [#allocation3], 4294967040 }
  0x43   :  { %6331 = dma.done.wait [#allocation6], 768  }
  0x44   :  { %6332 = vsyncadd [#allocation6], 4294966528 }
  0x45   :  { %6333 = dma.done.wait [#allocation9], 2048  }
  0x46   :  { %6334 = vsyncadd [#allocation9], 4294965248 }
  0x47   :  { %6335 = dma.done.wait [#allocation12], 1024  }
  0x48   :  { %6336 = vsyncadd [#allocation12], 4294966272  ;;  %v212_v0 = vld [vmem:[#allocation10 + $0x38] sm:$0xff]  ;;  %v211_v2 = vld [vmem:[#allocation10 + $0x30] sm:$0xff]  ;;  %vm123_vm0 = vcmask 523264   ;;  %s6347_s4 = smov 112   ;;  %v359_v30 = vlaneseq }
  0x49   :  { %v122_v1 = vld [vmem:[#allocation8 + $0x38] sm:$0xff]  ;;  %5883 = vmatprep.subr.mxu1 %v212_v0  ;;  %v121_v3 = vld [vmem:[#allocation8 + $0x30] sm:$0xff]  ;;  %v210_v4 = vld [vmem:[#allocation10 + $0x28] sm:$0xff]  ;;  %s6348_s5 = smov 120   ;;  %s6349_s8 = smov 104   ;;  %vm3260_vm1 = vcmask 64512  }
  0x4a   :  { %5864 = vmatprep.subr.mxu0 %v122_v1  ;;  %5884 = vmatpush3.msra.mxu1 %v212_v0  ;;  %v120_v5 = vld [vmem:[#allocation8 + $0x28] sm:$0xff]  ;;  %v209_v6 = vld [vmem:[#allocation10 + $0x20] sm:$0xff]  ;;  %v208_v8 = vld [vmem:[#allocation10 + $0x18] sm:$0xff]  ;;  %s6350_s9 = smov 88   ;;  %s6351_s10 = smov 96   ;;  %v360_v34 = vshrl.u32 %v359_v30, 7 }
  0x4b   :  { %5865 = vmatpush3.msra.mxu0 %v122_v1  ;;  %5885 = vmatprep.subr.mxu1 %v211_v2  ;;  %v119_v7 = vld [vmem:[#allocation8 + $0x20] sm:$0xff]  ;;  %v118_v9 = vld [vmem:[#allocation8 + $0x18] sm:$0xff]  ;;  %v207_v10 = vld [vmem:[#allocation10 + $0x10] sm:$0xff]  ;;  %s6352_s11 = smov 72   ;;  %s6353_s12 = smov 80   ;;  %vm4005_vm2 = vcmask 261120  }
  0x4c   :  { %5866 = vmatprep.subr.mxu0 %v121_v3  ;;  %5886 = vmatpush3.msra.mxu1 %v211_v2  ;;  %v117_v11 = vld [vmem:[#allocation8 + $0x10] sm:$0xff]  ;;  %v206_v12 = vld [vmem:[#allocation10 + $0x8] sm:$0xff]  ;;  %v205_v14 = vld [vmem:[#allocation10] sm:$0xff]  ;;  %s6354_s13 = smov 64   ;;  %v6355_v28 = vmov 1983009808  }
  0x4d   :  { %5867 = vmatpush3.msra.mxu0 %v121_v3  ;;  %5887 = vmatprep.subr.mxu1 %v210_v4  ;;  %v116_v13 = vld [vmem:[#allocation8 + $0x8] sm:$0xff]  ;;  %v111_v15 = vld [vmem:[#allocation5] sm:$0xff]  ;;  %v115_v16 = vld [vmem:[#allocation8] sm:$0xff]  ;;  %v357_v29 = vunpack.c.l.s4 %v6355_v28  ;;  %v6356_v31 = vmov 1934713408   ;;  %s6357_s14 = smov 16  }
  0x4e   :  { %5868 = vmatprep.subr.mxu0 %v120_v5  ;;  %5888 = vmatpush3.msra.mxu1 %v210_v4  ;;  %v112_v17 = vld [vmem:[#allocation5 + $0x8] sm:$0xff]  ;;  %v109_v18 = vld [vmem:[#allocation2] sm:$0xff]  ;;  %v110_v20 = vld [vmem:[#allocation2 + $0x8] sm:$0xff]  ;;  %v421_v32 = vunpack.c.l.s4 %v6356_v31  ;;  %s6358_s15 = smov 24   ;;  %s6359_s16 = smov 32   ;;  %vm5432_vm3 = vcmask 130048  }
  0x4f   :  { %5869 = vmatpush3.msra.mxu0 %v120_v5  ;;  %5889 = vmatprep.subr.mxu1 %v209_v6  ;;  %v113_v19 = vld [vmem:[#allocation5 + $0x10] sm:$0xff]  ;;  %v114_v21 = vld [vmem:[#allocation5 + $0x18] sm:$0xff]  ;;  %v358_v33 = vunpack.c.0.s8 %v357_v29  ;;  %s6360_s1 = smov 40   ;;  %s6361_s17 = smov 48   ;;  %vm5435_vm4 = vcmask 195584   ;;  %vm5440_vm5 = vcmask 326656  }
  0x50   :  { %5870 = vmatprep.subr.mxu0 %v119_v7  ;;  %5890 = vmatpush3.msra.mxu1 %v209_v6  ;;  %v422_v37 = vunpack.c.0.s8 %v421_v32  ;;  %s6362_s18 = smov 56   ;;  %vm5443_vm6 = vcmask 392192   ;;  %vm5446_vm7 = vcmask 457728   ;;  %s6363_s20 = smov [#allocation13]  }
  0x51   :  { %5871 = vmatpush3.msra.mxu0 %v119_v7  ;;  %5891 = vmatprep.subr.mxu1 %v208_v8  ;;  %v6510_v38 = vsub.s32 %v358_v33, %v360_v34  ;;  %s5552_s21 = sshll.u32 %s6363_s20, 4  ;;  %s5553_s21 = int_to_ptr.vmem [resolvable:$true] %s5552_s21 }
  0x52   :  { %5872 = vmatprep.subr.mxu0 %v118_v9  ;;  %5892 = vmatpush3.msra.mxu1 %v208_v8  ;;  %v6515_v45 = vsub.s32 %v422_v37, %v360_v34  ;;  %s6309_s22 = scalar_lea.vmem %s5553_s21, 256  ;;  %p6314_p3 = scmp.lt.s32.totalorder %s5553_s21, %s5553_s21 }
  0x53   :  { %5873 = vmatpush3.msra.mxu0 %v118_v9  ;;  %5893 = vmatprep.subr.mxu1 %v207_v10  ;;  %p6310_p2 = scmp.ne.s32.totalorder %s5553_s21, %s6309_s22  ;;  %p6315_p4 = scmp.lt.s32.totalorder %s6309_s22, %s6309_s22 }
  0x54   :  { %5874 = vmatprep.subr.mxu0 %v117_v11  ;;  %5894 = vmatpush3.msra.mxu1 %v207_v10 }
  0x55   :  { %5875 = vmatpush3.msra.mxu0 %v117_v11  ;;  %5895 = vmatprep.subr.mxu1 %v206_v12  ;;  %p6316_p5 = por %p6315_p4, %p6314_p3 }
  0x56   :  { %5876 = vmatprep.subr.mxu0 %v116_v13  ;;  %5896 = vmatpush3.msra.mxu1 %v206_v12 }
  0x57   :  { %5877 = vmatpush3.msra.mxu0 %v116_v13  ;;  %5897 = vmatprep.subr.mxu1 %v205_v14  ;;  %p6317_p6 = pnand %p6316_p5, %p6310_p2 }
  0x58   :  { %5899 = vmatprep.mubr.msk.f32.mxu1 %vm123_vm0, %v111_v15  ;;  %5898 = vmatpush3.msra.mxu1 %v205_v14 }
  0x59   :  { %5878 = vmatprep.subr.mxu0 %v115_v16  ;;  %5900 = vmatmul.mubr.msk.f32.vlgmr.msra.gmra.mxu1 %vm123_vm0, %v112_v17 }
  0x5a   :  { %5879 = vmatpush3.msra.mxu0 %v115_v16  ;;  %5880 = vmatprep.mubr.msk.f32.mxu0 %vm123_vm0, %v109_v18 }
  0x5b   :  { %5902 = vmatprep.mubr.msk.f32.mxu1 %vm123_vm0, %v113_v19  ;;  %5881 = vmatmul.mubr.msk.f32.vlgmr.msra.gmra.mxu0 %vm123_vm0, %v110_v20 }
  0x5d   :  { %5903 = vmatmul.mubr.msk.f32.gmra.mxu1 %vm123_vm0, %v114_v21 }
 0x119   :  { %v6446_v22 = vpop.f32.mrf.mxu1 }
 0x11a   :  { %916 = vrot.lane.b32.xlu1 %v6446_v22, %s6347_s4  ;;  %904 = vrot.lane.b32.xlu0 %v6446_v22, %s6348_s5 }
 0x11b   :  { %v6450_v23 = vpop.f32.mrf.mxu0  ;;  %v6456_v24 = vpop.f32.mrf.mxu1 }
 0x11d   :  { %v6460_v25 = vpop.f32.mrf.mxu0  ;;  %v6466_v26 = vpop.f32.mrf.mxu1 }
 0x11e   :  { %928 = vrot.lane.b32.xlu0 %v6446_v22, %s6349_s8  ;;  %314 = vrot.lane.b32.xlu1 %v6450_v23, %s6348_s5 }
 0x11f   :  { %v6470_v27 = vpop.f32.mrf.mxu1 }
 0x122   :  { %320 = vrot.lane.b32.xlu0 %v6450_v23, %s6347_s4  ;;  %326 = vrot.lane.b32.xlu1 %v6450_v23, %s6349_s8 }
 0x126   :  { %914 = vrot.lane.b32.xlu0 %v6456_v24, %s6347_s4  ;;  %902 = vrot.lane.b32.xlu1 %v6456_v24, %s6348_s5 }
 0x12a   :  { %926 = vrot.lane.b32.xlu1 %v6456_v24, %s6349_s8  ;;  %312 = vrot.lane.b32.xlu0 %v6460_v25, %s6348_s5 }
 0x12e   :  { %318 = vrot.lane.b32.xlu1 %v6460_v25, %s6347_s4  ;;  %324 = vrot.lane.b32.xlu0 %v6460_v25, %s6349_s8 }
 0x132   :  { %932 = vrot.lane.b32.xlu1 %v6466_v26, %s6349_s8  ;;  %908 = vrot.lane.b32.xlu0 %v6466_v26, %s6348_s5 }
 0x136   :  { %906 = vrot.lane.b32.xlu1 %v6470_v27, %s6348_s5  ;;  %920 = vrot.lane.b32.xlu0 %v6466_v26, %s6347_s4 }
 0x13a   :  { %930 = vrot.lane.b32.xlu1 %v6470_v27, %s6349_s8  ;;  %918 = vrot.lane.b32.xlu0 %v6470_v27, %s6347_s4 }
 0x13e   :  { %956 = vrot.lane.b32.xlu1 %v6466_v26, %s6350_s9  ;;  %944 = vrot.lane.b32.xlu0 %v6466_v26, %s6351_s10 }
 0x142   :  { %980 = vrot.lane.b32.xlu1 %v6466_v26, %s6352_s11  ;;  %968 = vrot.lane.b32.xlu0 %v6466_v26, %s6353_s12 }
 0x146   :  { %952 = vrot.lane.b32.xlu1 %v6446_v22, %s6350_s9  ;;  %940 = vrot.lane.b32.xlu0 %v6446_v22, %s6351_s10 }
 0x14a   :  { %976 = vrot.lane.b32.xlu1 %v6446_v22, %s6352_s11  ;;  %964 = vrot.lane.b32.xlu0 %v6446_v22, %s6353_s12 }
 0x14e   :  { %950 = vrot.lane.b32.xlu1 %v6456_v24, %s6350_s9  ;;  %938 = vrot.lane.b32.xlu0 %v6456_v24, %s6351_s10 }
 0x152   :  { %974 = vrot.lane.b32.xlu1 %v6456_v24, %s6352_s11  ;;  %962 = vrot.lane.b32.xlu0 %v6456_v24, %s6353_s12 }
 0x156   :  { %954 = vrot.lane.b32.xlu1 %v6470_v27, %s6350_s9  ;;  %942 = vrot.lane.b32.xlu0 %v6470_v27, %s6351_s10 }
 0x15a   :  { %978 = vrot.lane.b32.xlu1 %v6470_v27, %s6352_s11  ;;  %966 = vrot.lane.b32.xlu0 %v6470_v27, %s6353_s12 }
 0x15e   :  { %336 = vrot.lane.b32.xlu1 %v6460_v25, %s6350_s9  ;;  %330 = vrot.lane.b32.xlu0 %v6460_v25, %s6351_s10 }
 0x162   :  { %348 = vrot.lane.b32.xlu1 %v6460_v25, %s6352_s11  ;;  %342 = vrot.lane.b32.xlu0 %v6460_v25, %s6353_s12 }
 0x166   :  { %338 = vrot.lane.b32.xlu1 %v6450_v23, %s6350_s9  ;;  %332 = vrot.lane.b32.xlu0 %v6450_v23, %s6351_s10 }
 0x16a   :  { %350 = vrot.lane.b32.xlu1 %v6450_v23, %s6352_s11  ;;  %344 = vrot.lane.b32.xlu0 %v6450_v23, %s6353_s12 }
 0x16e   :  { %2080 = vrot.lane.b32.xlu1 %v6466_v26, %s6354_s13  ;;  %2076 = vrot.lane.b32.xlu0 %v6446_v22, %s6354_s13 }
 0x172   :  { %2074 = vrot.lane.b32.xlu0 %v6456_v24, %s6354_s13 }
 0x176   :  { %2078 = vrot.lane.b32.xlu0 %v6470_v27, %s6354_s13 }
 0x18c   :  { %v917_v35 = vpop.permute.xlu1 %916  ;;  %v905_v36 = vpop.permute.xlu0 %904 }
 0x18d   :  { %2084 = vrot.lane.b32.xlu1 %v905_v36, %s6354_s13  ;;  %2092 = vrot.lane.b32.xlu0 %v917_v35, %s6354_s13  ;;  %v1122_v39 = vcombine.low %v6446_v22, %v917_v35  ;;  %v1123_v40 = vcombine.high %v6446_v22, %v917_v35 }
 0x18f   :  { %v1130_v46 = vrot.slane %v1122_v39, %v6510_v38  ;;  %v1137_v47 = vrot.slane %v1123_v40, %v6510_v38 }
 0x190   :  { %v929_v41 = vpop.permute.xlu0 %928  ;;  %v315_v42 = vpop.permute.xlu1 %314 }
 0x191   :  { %v1138_v43 = vcombine.low %v905_v36, %v929_v41  ;;  %v1139_v44 = vcombine.high %v905_v36, %v929_v41  ;;  %2100 = vrot.lane.b32.xlu1 %v929_v41, %s6354_s13 }
 0x193   :  { %v1146_v48 = vrot.slane %v1138_v43, %v6510_v38  ;;  %v1153_v49 = vrot.slane %v1139_v44, %v6510_v38 }
 0x194   :  { %v321_v50 = vpop.permute.xlu0 %320  ;;  %v327_v51 = vpop.permute.xlu1 %326 }
 0x195   :  { %v1186_v52 = vcombine.low %v1130_v46, %v1146_v48  ;;  %v1187_v53 = vcombine.high %v1130_v46, %v1146_v48  ;;  %v1202_v54 = vcombine.low %v1137_v47, %v1153_v49  ;;  %v1203_v55 = vcombine.high %v1137_v47, %v1153_v49 }
 0x196   :  { %v490_v56 = vcombine.low %v6450_v23, %v321_v50  ;;  %v491_v57 = vcombine.high %v6450_v23, %v321_v50  ;;  %v506_v58 = vcombine.low %v315_v42, %v327_v51  ;;  %v507_v59 = vcombine.high %v315_v42, %v327_v51 }
 0x197   :  { %v1194_v60 = vrot.slane %v1186_v52, %v6515_v45  ;;  %v1201_v61 = vrot.slane %v1187_v53, %v6515_v45  ;;  %v1210_v62 = vrot.slane %v1202_v54, %v6515_v45  ;;  %v1217_v63 = vrot.slane %v1203_v55, %v6515_v45 }
 0x198   :  { %v498_v0 = vrot.slane %v490_v56, %v6510_v38  ;;  %v505_v1 = vrot.slane %v491_v57, %v6510_v38  ;;  %v514_v2 = vrot.slane %v506_v58, %v6510_v38  ;;  %v521_v3 = vrot.slane %v507_v59, %v6510_v38  ;;  %v6531_v4 = vpop.permute.xlu0 %914  ;;  %v6533_v5 = vpop.permute.xlu1 %902 }
 0x199   :  { %v5597_v6 = vcombine.low %v1194_v60, %v1201_v61  ;;  %v5599_v7 = vcombine.high %v1194_v60, %v1201_v61  ;;  %v5601_v8 = vcombine.low %v1210_v62, %v1217_v63  ;;  %v5603_v9 = vcombine.high %v1210_v62, %v1217_v63 }
 0x19a   :  { %v554_v10 = vcombine.low %v498_v0, %v514_v2  ;;  %v555_v11 = vcombine.high %v498_v0, %v514_v2  ;;  %v570_v12 = vcombine.low %v505_v1, %v521_v3  ;;  %v571_v13 = vcombine.high %v505_v1, %v521_v3 }
 0x19b   :  { %v986_v14 = vcombine.low %v6456_v24, %v6531_v4  ;;  %v987_v15 = vcombine.high %v6456_v24, %v6531_v4  ;;  %v6540_v16 = vrot.slane %v5597_v6, %v6510_v38  ;;  %v6543_v17 = vrot.slane %v5599_v7, %v6510_v38 }
 0x19c   :  { %v562_v18 = vrot.slane %v554_v10, %v6515_v45  ;;  %v569_v19 = vrot.slane %v555_v11, %v6515_v45  ;;  %v578_v20 = vrot.slane %v570_v12, %v6515_v45  ;;  %v585_v21 = vrot.slane %v571_v13, %v6515_v45  ;;  %v6549_v22 = vpop.permute.xlu1 %926  ;;  %v313_v23 = vpop.permute.xlu0 %312 }
 0x19d   :  { %v994_v28 = vrot.slane %v986_v14, %v6510_v38  ;;  %v1001_v24 = vrot.slane %v987_v15, %v6510_v38  ;;  %v1002_v29 = vcombine.low %v6533_v5, %v6549_v22  ;;  %v1003_v30 = vcombine.high %v6533_v5, %v6549_v22 }
 0x19e   :  { %v5581_v31 = vcombine.low %v562_v18, %v569_v19  ;;  %v5583_v32 = vcombine.high %v562_v18, %v569_v19  ;;  %v5585_v33 = vcombine.low %v578_v20, %v585_v21  ;;  %v5587_v34 = vcombine.high %v578_v20, %v585_v21 }
 0x19f   :  { %v1010_v35 = vrot.slane %v1002_v29, %v6510_v38  ;;  %v1017_v36 = vrot.slane %v1003_v30, %v6510_v38  ;;  %v6560_v37 = vrot.slane %v5601_v8, %v6510_v38  ;;  %v6563_v39 = vrot.slane %v5603_v9, %v6510_v38 }
 0x1a0   :  { %v6566_v40 = vrot.slane %v5581_v31, %v6510_v38  ;;  %v6569_v41 = vrot.slane %v5583_v32, %v6510_v38  ;;  %v6572_v42 = vrot.slane %v5585_v33, %v6510_v38  ;;  %v6575_v43 = vrot.slane %v5587_v34, %v6510_v38  ;;  %v319_v44 = vpop.permute.xlu1 %318  ;;  %v325_v46 = vpop.permute.xlu0 %324 }
 0x1a1   :  { %v1050_v47 = vcombine.low %v994_v28, %v1010_v35  ;;  %v1051_v48 = vcombine.high %v994_v28, %v1010_v35  ;;  %v1066_v49 = vcombine.low %v1001_v24, %v1017_v36  ;;  %v1067_v50 = vcombine.high %v1001_v24, %v1017_v36 }
 0x1a2   :  { %v354_v59 = vcombine.low %v6460_v25, %v319_v44  ;;  %v355_v60 = vcombine.high %v6460_v25, %v319_v44  ;;  %v370_v61 = vcombine.low %v313_v23, %v325_v46  ;;  %v371_v62 = vcombine.high %v313_v23, %v325_v46 }
 0x1a3   :  { %v6586_v55 = vrot.slane %v1050_v47, %v6515_v45  ;;  %v6589_v56 = vrot.slane %v1051_v48, %v6515_v45  ;;  %v6592_v57 = vrot.slane %v1066_v49, %v6515_v45  ;;  %v6595_v58 = vrot.slane %v1067_v50, %v6515_v45 }
 0x1a4   :  { %v6599_v63 = vpop.permute.xlu1 %932  ;;  %v6601_v0 = vpop.permute.xlu0 %908  ;;  %v362_v25 = vrot.slane %v354_v59, %v6510_v38  ;;  %v369_v7 = vrot.slane %v355_v60, %v6510_v38  ;;  %v378_v8 = vrot.slane %v370_v61, %v6510_v38  ;;  %v385_v9 = vrot.slane %v371_v62, %v6510_v38 }
 0x1a5   :  { %v5589_v1 = vcombine.low %v6586_v55, %v6589_v56  ;;  %v1410_v10 = vcombine.low %v6601_v0, %v6599_v63  ;;  %v1411_v11 = vcombine.high %v6601_v0, %v6599_v63  ;;  %v1730_v12 = vcombine.low %v6540_v16, %v6543_v17 }
 0x1a6   :  { %v1762_v13 = vcombine.low %v6560_v37, %v6563_v39  ;;  %v418_v14 = vcombine.low %v362_v25, %v378_v8  ;;  %v419_v15 = vcombine.high %v362_v25, %v378_v8  ;;  %v434_v18 = vcombine.low %v369_v7, %v385_v9 }
 0x1a7   :  { %v435_v19 = vcombine.high %v369_v7, %v385_v9  ;;  %v1418_v23 = vrot.slane %v1410_v10, %v6510_v38  ;;  %v1425_v28 = vrot.slane %v1411_v11, %v6510_v38  ;;  %v6640_v36 = vrot.slane %v1730_v12, %v6515_v45 }
 0x1a8   :  { %v6623_v20 = vpop.permute.xlu1 %906  ;;  %v6625_v21 = vpop.permute.xlu0 %920  ;;  %v426_v30 = vrot.slane %v418_v14, %v6515_v45  ;;  %v433_v31 = vrot.slane %v419_v15, %v6515_v45  ;;  %v442_v32 = vrot.slane %v434_v18, %v6515_v45  ;;  %v6643_v44 = vrot.slane %v1762_v13, %v6515_v45 }
 0x1a9   :  { %v1394_v24 = vcombine.low %v6466_v26, %v6625_v21  ;;  %v1395_v29 = vcombine.high %v6466_v26, %v6625_v21  ;;  %v449_v33 = vrot.slane %v435_v19, %v6515_v45 }
 0x1aa   :  { %v5573_v46 = vcombine.low %v426_v30, %v433_v31  ;;  %v5575_v26 = vcombine.high %v426_v30, %v433_v31 }
 0x1ab   :  { %v1402_v34 = vrot.slane %v1394_v24, %v6510_v38  ;;  %v1409_v35 = vrot.slane %v1395_v29, %v6510_v38  ;;  %v5577_v47 = vcombine.low %v442_v32, %v449_v33  ;;  %v5579_v48 = vcombine.high %v442_v32, %v449_v33 }
 0x1ac   :  { %v6645_v49 = vpop.permute.xlu1 %930  ;;  %v6647_v50 = vpop.permute.xlu0 %918 }
 0x1ad   :  { %v1458_v59 = vcombine.low %v1402_v34, %v1418_v23  ;;  %v1459_v60 = vcombine.high %v1402_v34, %v1418_v23  ;;  %v1474_v61 = vcombine.low %v1409_v35, %v1425_v28  ;;  %v1475_v62 = vcombine.high %v1409_v35, %v1425_v28 }
 0x1ae   :  { %v1274_v25 = vcombine.low %v6623_v20, %v6645_v49  ;;  %v1275_v7 = vcombine.high %v6623_v20, %v6645_v49  ;;  %v1258_v8 = vcombine.low %v6470_v27, %v6647_v50  ;;  %v1259_v9 = vcombine.high %v6470_v27, %v6647_v50 }
 0x1af   :  { %v1466_v10 = vrot.slane %v1458_v59, %v6515_v45  ;;  %v1473_v11 = vrot.slane %v1459_v60, %v6515_v45  ;;  %v1482_v12 = vrot.slane %v1474_v61, %v6515_v45  ;;  %v1489_v13 = vrot.slane %v1475_v62, %v6515_v45 }
 0x1b0   :  { %v1282_v14 = vrot.slane %v1274_v25, %v6510_v38  ;;  %v1289_v15 = vrot.slane %v1275_v7, %v6510_v38  ;;  %v1266_v18 = vrot.slane %v1258_v8, %v6510_v38  ;;  %v1273_v19 = vrot.slane %v1259_v9, %v6510_v38  ;;  %v6665_v23 = vpop.permute.xlu1 %956  ;;  %v6667_v28 = vpop.permute.xlu0 %944 }
 0x1b1   :  { %v5613_v27 = vcombine.low %v1466_v10, %v1473_v11  ;;  %v5615_v24 = vcombine.high %v1466_v10, %v1473_v11  ;;  %v5617_v29 = vcombine.low %v1482_v12, %v1489_v13  ;;  %v5619_v30 = vcombine.high %v1482_v12, %v1489_v13 }
 0x1b2   :  { %v1322_v31 = vcombine.low %v1266_v18, %v1282_v14  ;;  %v1323_v32 = vcombine.high %v1266_v18, %v1282_v14  ;;  %v1338_v33 = vcombine.low %v1273_v19, %v1289_v15  ;;  %v1339_v34 = vcombine.high %v1273_v19, %v1289_v15 }
 0x1b3   :  { %v6670_v35 = vrot.slane %v5573_v46, %v6510_v38  ;;  %v6673_v59 = vrot.slane %v5575_v26, %v6510_v38  ;;  %v6676_v60 = vrot.slane %v5577_v47, %v6510_v38  ;;  %v6679_v61 = vrot.slane %v5579_v48, %v6510_v38 }
 0x1b4   :  { %v1330_v62 = vrot.slane %v1322_v31, %v6515_v45  ;;  %v1337_v25 = vrot.slane %v1323_v32, %v6515_v45  ;;  %v6684_v7 = vrot.slane %v1338_v33, %v6515_v45  ;;  %v6687_v8 = vrot.slane %v1339_v34, %v6515_v45  ;;  %v6689_v46 = vpop.permute.xlu1 %980  ;;  %v6691_v26 = vpop.permute.xlu0 %968 }
 0x1b5   :  { %v690_v47 = vcombine.low %v6670_v35, %v6673_v59  ;;  %v722_v48 = vcombine.low %v6676_v60, %v6679_v61  ;;  %v1442_v9 = vcombine.low %v6665_v23, %v6689_v46  ;;  %v1443_v10 = vcombine.high %v6665_v23, %v6689_v46 }
 0x1b6   :  { %v5605_v11 = vcombine.low %v1330_v62, %v1337_v25  ;;  %v5607_v12 = vcombine.high %v1330_v62, %v1337_v25  ;;  %v5609_v13 = vcombine.low %v6684_v7, %v6687_v8  ;;  %v5611_v14 = vcombine.high %v6684_v7, %v6687_v8 }
 0x1b7   :  { %v698_v15 = vrot.slane %v690_v47, %v6515_v45  ;;  %v730_v18 = vrot.slane %v722_v48, %v6515_v45  ;;  %v1450_v19 = vrot.slane %v1442_v9, %v6510_v38  ;;  %v1457_v31 = vrot.slane %v1443_v10, %v6510_v38 }
 0x1b8   :  { %v1426_v32 = vcombine.low %v6667_v28, %v6691_v26  ;;  %v1427_v33 = vcombine.high %v6667_v28, %v6691_v26  ;;  %v953_v34 = vpop.permute.xlu1 %952  ;;  %v941_v62 = vpop.permute.xlu0 %940  ;;  %v6714_v25 = vrot.slane %v5613_v27, %v6510_v38  ;;  %v6717_v7 = vrot.slane %v5615_v24, %v6510_v38 }
 0x1b9   :  { %v754_v8 = vcombine.low %v698_v15, %v730_v18  ;;  %v755_v47 = vcombine.high %v698_v15, %v730_v18  ;;  %2116 = vrot.lane.b32.xlu1 %v953_v34, %s6354_s13  ;;  %2108 = vrot.lane.b32.xlu0 %v941_v62, %s6354_s13  ;;  %v6722_v48 = vrot.slane %v5617_v29, %v6510_v38 }
 0x1ba   :  { %v1434_v9 = vrot.slane %v1426_v32, %v6510_v38  ;;  %v1441_v10 = vrot.slane %v1427_v33, %v6510_v38  ;;  %v6727_v54 = vrot.slane %v5619_v30, %v6510_v38  ;;  %v2002_v27 = vcombine.low %v6714_v25, %v6717_v7 }
 0x1bb   :  { %5913 = vmatprep.mubr.msk.f32.mxu0 %vm3260_vm1, %v754_v8  ;;  %5924 = vmatprep.mubr.msk.f32.mxu1 %vm3260_vm1, %v755_v47  ;;  %v6734_v24 = vrot.slane %v5605_v11, %v6510_v38  ;;  %v6737_v29 = vrot.slane %v5607_v12, %v6510_v38  ;;  %v6740_v15 = vrot.slane %v5609_v13, %v6510_v38 }
 0x1bc   :  { %v1490_v18 = vcombine.low %v1434_v9, %v1450_v19  ;;  %v1491_v32 = vcombine.high %v1434_v9, %v1450_v19  ;;  %v1506_v30 = vcombine.low %v1441_v10, %v1457_v31  ;;  %v1507_v33 = vcombine.high %v1441_v10, %v1457_v31  ;;  %v6742_v52 = vpop.permute.xlu1 %976  ;;  %v6744_v53 = vpop.permute.xlu0 %964 }
 0x1bd   :  { %v2010_v8 = vrot.slane %v2002_v27, %v6515_v45  ;;  %v2034_v11 = vcombine.low %v6722_v48, %v6727_v54  ;;  %v1170_v47 = vcombine.low %v953_v34, %v6742_v52  ;;  %v1171_v12 = vcombine.high %v953_v34, %v6742_v52  ;;  %2082 = vrot.lane.b32.xlu1 %v6533_v5, %s6354_s13 }
 0x1be   :  { %v6754_v13 = vrot.slane %v1490_v18, %v6515_v45  ;;  %v6757_v19 = vrot.slane %v1491_v32, %v6515_v45  ;;  %v6760_v31 = vrot.slane %v1506_v30, %v6515_v45  ;;  %v6763_v9 = vrot.slane %v1507_v33, %v6515_v45  ;;  %2090 = vrot.lane.b32.xlu0 %v6531_v4, %s6354_s13 }
 0x1bf   :  { %v2042_v34 = vrot.slane %v2034_v11, %v6515_v45  ;;  %v1178_v10 = vrot.slane %v1170_v47, %v6510_v38  ;;  %v1185_v5 = vrot.slane %v1171_v12, %v6510_v38  ;;  %v1154_v27 = vcombine.low %v941_v62, %v6744_v53 }
 0x1c0   :  { %v6779_v33 = vpop.permute.xlu1 %950  ;;  %v6781_v11 = vpop.permute.xlu0 %938  ;;  %v1155_v51 = vcombine.high %v941_v62, %v6744_v53  ;;  %v6788_v32 = vrot.slane %v5611_v14, %v6510_v38  ;;  %v1866_v30 = vcombine.low %v6734_v24, %v6737_v29  ;;  %v6794_v4 = vcombine.low %v6640_v36, %v6643_v44 }
 0x1c1   :  { %v2066_v47 = vcombine.low %v2010_v8, %v2042_v34  ;;  %v2067_v12 = vcombine.high %v2010_v8, %v2042_v34  ;;  %v1162_v6 = vrot.slane %v1154_v27, %v6510_v38  ;;  %2098 = vrot.lane.b32.xlu1 %v6549_v22, %s6354_s13  ;;  %v6798_v8 = vcombine.high %v6640_v36, %v6643_v44 }
 0x1c2   :  { %2088 = vrot.lane.b32.xlu0 %v6601_v0, %s6354_s13  ;;  %v1169_v22 = vrot.slane %v1155_v51, %v6510_v38  ;;  %v1874_v34 = vrot.slane %v1866_v30, %v6515_v45  ;;  %v1898_v36 = vcombine.low %v6740_v15, %v6788_v32  ;;  %v6818_v51 = vrot.slane %v5589_v1, %v6510_v38 }
 0x1c3   :  { %5905 = vmatprep.subr.msk.mxu0 %vm3260_vm1, %v2066_v47  ;;  %5916 = vmatprep.subr.msk.mxu1 %vm3260_vm1, %v2067_v12  ;;  %v1218_v14 = vcombine.low %v1162_v6, %v1178_v10  ;;  %v1219_v62 = vcombine.high %v1162_v6, %v1178_v10 }
 0x1c4   :  { %5906 = vmatpush3.xpose.msk.msra.mxu0 %vm3260_vm1, %v2066_v47  ;;  %5917 = vmatpush3.xpose.msk.msra.mxu1 %vm3260_vm1, %v2067_v12  ;;  %v6810_v44 = vpop.permute.xlu1 %974  ;;  %v6812_v0 = vpop.permute.xlu0 %962  ;;  %v1234_v27 = vcombine.low %v1169_v22, %v1185_v5  ;;  %v1235_v30 = vcombine.high %v1169_v22, %v1185_v5  ;;  %v1906_v47 = vrot.slane %v1898_v36, %v6515_v45 }
 0x1c5   :  { %7868 = vst [vmem:[#allocation19_spill] sm:$0xff] %v6810_v44  ;;  %v6821_v6 = vrot.slane %v1218_v14, %v6515_v45  ;;  %v6824_v10 = vrot.slane %v1219_v62, %v6515_v45  ;;  %2096 = vrot.lane.b32.xlu1 %v6625_v21, %s6354_s13  ;;  %v1034_v12 = vcombine.low %v6779_v33, %v6810_v44 }
 0x1c6   :  { %v1035_v1 = vcombine.high %v6779_v33, %v6810_v44  ;;  %v1018_v14 = vcombine.low %v6781_v11, %v6812_v0  ;;  %2120 = vrot.lane.b32.xlu0 %v6665_v23, %s6354_s13  ;;  %v6838_v62 = vrot.slane %v1234_v27, %v6515_v45  ;;  %v6841_v5 = vrot.slane %v1235_v30, %v6515_v45 }
 0x1c7   :  { %v1930_v36 = vcombine.low %v1874_v34, %v1906_v47  ;;  %v1931_v18 = vcombine.high %v1874_v34, %v1906_v47  ;;  %v1042_v3 = vrot.slane %v1034_v12, %v6510_v38  ;;  %v1019_v30 = vcombine.high %v6781_v11, %v6812_v0 }
 0x1c8   :  { %v1049_v2 = vrot.slane %v1035_v1, %v6510_v38  ;;  %v6849_v44 = vpop.permute.xlu1 %954  ;;  %v1026_v21 = vrot.slane %v1018_v14, %v6510_v38  ;;  %v6858_v22 = vpop.permute.xlu0 %942  ;;  %v7869_v34 = vcombine.high %v6586_v55, %v6589_v56  ;;  %v7870_v12 = vcombine.low %v6592_v57, %v6595_v58 }
 0x1c9   :  { %2104 = vrot.lane.b32.xlu1 %v6599_v63, %s6354_s13  ;;  %5907 = vmatprep.subr.msk.mxu0 %vm3260_vm1, %v1930_v36  ;;  %v7871_v63 = vcombine.high %v6592_v57, %v6595_v58  ;;  %v1033_v55 = vrot.slane %v1019_v30, %v6510_v38  ;;  %v2003_v58 = vcombine.high %v6714_v25, %v6717_v7 }
 0x1ca   :  { %5918 = vmatprep.subr.msk.mxu1 %vm3260_vm1, %v1931_v18  ;;  %v6868_v47 = vrot.slane %v7869_v34, %v6510_v38  ;;  %v6874_v1 = vrot.slane %v7870_v12, %v6510_v38  ;;  %5908 = vmatpush3.xpose.msk.msra.mxu0 %vm3260_vm1, %v1930_v36  ;;  %v1082_v56 = vcombine.low %v1026_v21, %v1042_v3 }
 0x1cb   :  { %v6880_v14 = vrot.slane %v7871_v63, %v6510_v38  ;;  %5919 = vmatpush3.xpose.msk.msra.mxu1 %vm3260_vm1, %v1931_v18  ;;  %v1083_v34 = vcombine.high %v1026_v21, %v1042_v3  ;;  %5909 = vmatprep.subr.msk.mxu0 %vm3260_vm1, %v6794_v4  ;;  %v1098_v21 = vcombine.low %v1033_v55, %v1049_v2 }
 0x1cc   :  { %5920 = vmatprep.subr.msk.mxu1 %vm3260_vm1, %v6798_v8  ;;  %v1594_v12 = vcombine.low %v6818_v51, %v6868_v47  ;;  %v6896_v18 = vrot.slane %v1082_v56, %v6515_v45  ;;  %v1099_v36 = vcombine.high %v1033_v55, %v1049_v2  ;;  %2094 = vrot.lane.b32.xlu0 %v6647_v50, %s6354_s13  ;;  %v6903_v30 = vpop.permute.xlu1 %978  ;;  %v967_v55 = vpop.permute.xlu0 %966 }
 0x1cd   :  { %v1626_v57 = vcombine.low %v6874_v1, %v6880_v14  ;;  %v6899_v3 = vrot.slane %v1083_v34, %v6515_v45  ;;  %v2017_v23 = vrot.slane %v2003_v58, %v6515_v45  ;;  %v2035_v25 = vcombine.high %v6722_v48, %v6727_v54  ;;  %2112 = vrot.lane.b32.xlu1 %v6667_v28, %s6354_s13 }
 0x1ce   :  { %v1602_v63 = vrot.slane %v1594_v12, %v6515_v45  ;;  %5910 = vmatpush3.xpose.msk.msra.mxu0 %vm3260_vm1, %v6794_v4  ;;  %v6917_v2 = vrot.slane %v1098_v21, %v6515_v45  ;;  %v6920_v50 = vrot.slane %v1099_v36, %v6515_v45  ;;  %v7872_v34 = vcombine.low %v6566_v40, %v6569_v41 }
 0x1cf   :  { %v1634_v27 = vrot.slane %v1626_v57, %v6515_v45  ;;  %5921 = vmatpush3.xpose.msk.msra.mxu1 %vm3260_vm1, %v6798_v8  ;;  %v5590_v7 = vcombine.low %v6896_v18, %v6899_v3  ;;  %v5592_v54 = vcombine.high %v6896_v18, %v6899_v3  ;;  %v2049_v4 = vrot.slane %v2035_v25, %v6515_v45 }
 0x1d0   :  { %v834_v12 = vrot.slane %v7872_v34, %v6515_v45  ;;  %v7873_v57 = vcombine.low %v6572_v42, %v6575_v43  ;;  %2110 = vrot.lane.b32.xlu0 %v6858_v22, %s6354_s13  ;;  %v1306_v36 = vcombine.low %v6849_v44, %v6903_v30  ;;  %v1307_v34 = vcombine.high %v6849_v44, %v6903_v30  ;;  %v331_v8 = vpop.permute.xlu0 %330 }
 0x1d1   :  { %v1658_v28 = vcombine.low %v1602_v63, %v1634_v27  ;;  %v1659_v48 = vcombine.high %v1602_v63, %v1634_v27  ;;  %v2068_v27 = vcombine.low %v2017_v23, %v2049_v4  ;;  %v2069_v21 = vcombine.high %v2017_v23, %v2049_v4  ;;  %2128 = vrot.lane.b32.xlu1 %v6691_v26, %s6354_s13 }
 0x1d2   :  { %v866_v58 = vrot.slane %v7873_v57, %v6515_v45  ;;  %v337_v57 = vpop.permute.xlu1 %336  ;;  %v1314_v56 = vrot.slane %v1306_v36, %v6510_v38  ;;  %v691_v23 = vcombine.high %v6670_v35, %v6673_v59  ;;  %v1290_v4 = vcombine.low %v6858_v22, %v967_v55 }
 0x1d3   :  { %5911 = vmatprep.subr.msk.mxu0 %vm3260_vm1, %v1658_v28  ;;  %5922 = vmatprep.subr.msk.mxu1 %vm3260_vm1, %v1659_v48  ;;  %v7885_v18 = vcombine.high %v6917_v2, %v6920_v50 }
 0x1d4   :  { %5912 = vmatpush3.xpose.msk.msra.mxu0 %vm3260_vm1, %v1658_v28  ;;  %5923 = vmatpush3.xpose.msk.msra.mxu1 %vm3260_vm1, %v1659_v48  ;;  %v890_v63 = vcombine.low %v834_v12, %v866_v58  ;;  %v891_v25 = vcombine.high %v834_v12, %v866_v58  ;;  %v723_v28 = vcombine.high %v6676_v60, %v6679_v61 }
 0x1d5   :  { %5927 = vmatprep.subr.msk.mxu0 %vm3260_vm1, %v2068_v27  ;;  %5938 = vmatprep.subr.msk.mxu1 %vm3260_vm1, %v2069_v21  ;;  %v1321_v48 = vrot.slane %v1307_v34, %v6510_v38  ;;  %v1291_v12 = vcombine.high %v6858_v22, %v967_v55  ;;  %v1867_v58 = vcombine.high %v6734_v24, %v6737_v29 }
 0x1d6   :  { %v705_v35 = vrot.slane %v691_v23, %v6515_v45  ;;  %v737_v59 = vrot.slane %v723_v28, %v6515_v45  ;;  %v1899_v60 = vcombine.high %v6740_v15, %v6788_v32  ;;  %v1298_v61 = vrot.slane %v1290_v4, %v6510_v38  ;;  %2126 = vrot.lane.b32.xlu0 %v967_v55, %s6354_s13 }
 0x1d7   :  { %5914 = vmatmul.mubr.msk.f32.vlgmr.msra.gmra.mxu0 %vm3260_vm1, %v890_v63  ;;  %5925 = vmatmul.mubr.msk.f32.vlgmr.msra.gmra.mxu1 %vm3260_vm1, %v891_v25  ;;  %v1305_v24 = vrot.slane %v1291_v12, %v6510_v38  ;;  %v1881_v26 = vrot.slane %v1867_v58, %v6515_v45  ;;  %v1731_v63 = vcombine.high %v6540_v16, %v6543_v17 }
 0x1d8   :  { %5928 = vmatpush3.xpose.msk.msra.mxu0 %vm3260_vm1, %v2068_v27  ;;  %5939 = vmatpush3.xpose.msk.msra.mxu1 %vm3260_vm1, %v2069_v21  ;;  %v756_v29 = vcombine.low %v705_v35, %v737_v59  ;;  %v757_v22 = vcombine.high %v705_v35, %v737_v59  ;;  %v1913_v36 = vrot.slane %v1899_v60, %v6515_v45  ;;  %v349_v21 = vpop.permute.xlu1 %348 }
 0x1d9   :  { %v1354_v15 = vcombine.low %v1298_v61, %v1314_v56  ;;  %v1355_v32 = vcombine.high %v1298_v61, %v1314_v56  ;;  %v1370_v27 = vcombine.low %v1305_v24, %v1321_v48  ;;  %v1371_v25 = vcombine.high %v1305_v24, %v1321_v48  ;;  %2136 = vrot.lane.b32.xlu1 %v6689_v46, %s6354_s13  ;;  %v343_v46 = vpop.permute.xlu0 %342 }
 0x1da   :  { %5935 = vmatprep.mubr.msk.f32.mxu0 %vm3260_vm1, %v756_v29  ;;  %5946 = vmatprep.mubr.msk.f32.mxu1 %vm3260_vm1, %v757_v22  ;;  %v1932_v34 = vcombine.low %v1881_v26, %v1913_v36  ;;  %v1933_v23 = vcombine.high %v1881_v26, %v1913_v36  ;;  %v1745_v28 = vrot.slane %v1731_v63, %v6515_v45 }
 0x1db   :  { %v6984_v16 = vrot.slane %v1354_v15, %v6515_v45  ;;  %v6987_v17 = vrot.slane %v1355_v32, %v6515_v45  ;;  %v6990_v55 = vrot.slane %v1370_v27, %v6515_v45  ;;  %v6993_v56 = vrot.slane %v1371_v25, %v6515_v45 }
 0x1dc   :  { %5929 = vmatprep.subr.msk.mxu0 %vm3260_vm1, %v1932_v34  ;;  %5940 = vmatprep.subr.msk.mxu1 %vm3260_vm1, %v1933_v23  ;;  %v1763_v48 = vcombine.high %v6560_v37, %v6563_v39  ;;  %v402_v4 = vcombine.low %v337_v57, %v349_v21  ;;  %v403_v12 = vcombine.high %v337_v57, %v349_v21  ;;  %v339_v27 = vpop.permute.xlu1 %338 }
 0x1dd   :  { %v5606_v58 = vcombine.low %v6984_v16, %v6987_v17  ;;  %v5608_v35 = vcombine.high %v6984_v16, %v6987_v17  ;;  %v5610_v59 = vcombine.low %v6990_v55, %v6993_v56  ;;  %v5612_v60 = vcombine.high %v6990_v55, %v6993_v56  ;;  %5930 = vmatpush3.xpose.msk.msra.mxu0 %vm3260_vm1, %v1932_v34  ;;  %v333_v25 = vpop.permute.xlu0 %332 }
 0x1de   :  { %5941 = vmatpush3.xpose.msk.msra.mxu1 %vm3260_vm1, %v1933_v23  ;;  %v1777_v37 = vrot.slane %v1763_v48, %v6515_v45  ;;  %v410_v39 = vrot.slane %v402_v4, %v6510_v38  ;;  %v417_v57 = vrot.slane %v403_v12, %v6510_v38  ;;  %v386_v61 = vcombine.low %v331_v8, %v343_v46 }
 0x1df   :  { %v387_v24 = vcombine.high %v331_v8, %v343_v46  ;;  %v1595_v26 = vcombine.high %v6818_v51, %v6868_v47  ;;  %v1627_v29 = vcombine.high %v6874_v1, %v6880_v14  ;;  %v7874_v22 = vcombine.low %v6754_v13, %v6757_v19  ;;  %2086 = vrot.lane.b32.xlu1 %v6623_v20, %s6354_s13 }
 0x1e0   :  { %v1796_v63 = vcombine.low %v1745_v28, %v1777_v37  ;;  %v1797_v15 = vcombine.high %v1745_v28, %v1777_v37  ;;  %v394_v32 = vrot.slane %v386_v61, %v6510_v38  ;;  %v7875_v51 = vcombine.high %v6754_v13, %v6757_v19 }
 0x1e1   :  { %v7020_v36 = vrot.slane %v7874_v22, %v6510_v38  ;;  %v401_v1 = vrot.slane %v387_v24, %v6510_v38  ;;  %v1609_v14 = vrot.slane %v1595_v26, %v6515_v45  ;;  %v1641_v8 = vrot.slane %v1627_v29, %v6515_v45 }
 0x1e2   :  { %v7029_v47 = vrot.slane %v7875_v51, %v6510_v38  ;;  %v7876_v20 = vcombine.low %v6760_v31, %v6763_v9  ;;  %5931 = vmatprep.subr.msk.mxu0 %vm3260_vm1, %v1796_v63  ;;  %5942 = vmatprep.subr.msk.mxu1 %vm3260_vm1, %v1797_v15  ;;  %v450_v13 = vcombine.low %v394_v32, %v410_v39  ;;  %v345_v51 = vpop.permute.xlu0 %344 }
 0x1e3   :  { %v451_v19 = vcombine.high %v394_v32, %v410_v39  ;;  %v7877_v34 = vcombine.high %v6760_v31, %v6763_v9  ;;  %5932 = vmatpush3.xpose.msk.msra.mxu0 %vm3260_vm1, %v1796_v63  ;;  %5943 = vmatpush3.xpose.msk.msra.mxu1 %vm3260_vm1, %v1797_v15  ;;  %v466_v28 = vcombine.low %v401_v1, %v417_v57 }
 0x1e4   :  { %v7038_v21 = vrot.slane %v7876_v20, %v6510_v38  ;;  %v467_v46 = vcombine.high %v401_v1, %v417_v57  ;;  %v1660_v48 = vcombine.low %v1609_v14, %v1641_v8  ;;  %v458_v4 = vrot.slane %v450_v13, %v6515_v45  ;;  %2102 = vrot.lane.b32.xlu1 %v6645_v49, %s6354_s13 }
 0x1e5   :  { %v7046_v23 = vrot.slane %v7877_v34, %v6510_v38  ;;  %v465_v12 = vrot.slane %v451_v19, %v6515_v45  ;;  %v1661_v37 = vcombine.high %v1609_v14, %v1641_v8  ;;  %v2018_v39 = vcombine.low %v7020_v36, %v7029_v47 }
 0x1e6   :  { %v474_v31 = vrot.slane %v466_v28, %v6515_v45  ;;  %v481_v9 = vrot.slane %v467_v46, %v6515_v45  ;;  %5933 = vmatprep.subr.msk.mxu0 %vm3260_vm1, %v1660_v48  ;;  %v7878_v61 = vcombine.high %v6566_v40, %v6569_v41  ;;  %v7879_v22 = vcombine.high %v6572_v42, %v6575_v43  ;;  %v351_v41 = vpop.permute.xlu1 %350 }
 0x1e7   :  { %v2050_v57 = vcombine.low %v7038_v21, %v7046_v23  ;;  %v5574_v26 = vcombine.low %v458_v4, %v465_v12  ;;  %v5576_v29 = vcombine.high %v458_v4, %v465_v12  ;;  %5944 = vmatprep.subr.msk.mxu1 %vm3260_vm1, %v1661_v37  ;;  %v2026_v49 = vrot.slane %v2018_v39, %v6515_v45 }
 0x1e8   :  { %v841_v24 = vrot.slane %v7878_v61, %v6515_v45  ;;  %v873_v63 = vrot.slane %v7879_v22, %v6515_v45  ;;  %v5578_v15 = vcombine.low %v474_v31, %v481_v9  ;;  %v5580_v32 = vcombine.high %v474_v31, %v481_v9  ;;  %5934 = vmatpush3.xpose.msk.msra.mxu0 %vm3260_vm1, %v1660_v48 }
 0x1e9   :  { %5945 = vmatpush3.xpose.msk.msra.mxu1 %vm3260_vm1, %v1661_v37  ;;  %v2058_v40 = vrot.slane %v2050_v57, %v6515_v45  ;;  %v7075_v1 = vrot.slane %v5574_v26, %v6510_v38  ;;  %v7078_v14 = vrot.slane %v5576_v29, %v6510_v38  ;;  %2118 = vrot.lane.b32.xlu1 %v6849_v44, %s6354_s13 }
 0x1ea   :  { %v892_v8 = vcombine.low %v841_v24, %v873_v63  ;;  %v893_v20 = vcombine.high %v841_v24, %v873_v63  ;;  %v7083_v42 = vrot.slane %v5578_v15, %v6510_v38  ;;  %v7086_v43 = vrot.slane %v5580_v32, %v6510_v38 }
 0x1eb   :  { %v2070_v13 = vcombine.low %v2026_v49, %v2058_v40  ;;  %v2071_v19 = vcombine.high %v2026_v49, %v2058_v40  ;;  %v538_v34 = vcombine.low %v339_v27, %v351_v41  ;;  %v539_v28 = vcombine.high %v339_v27, %v351_v41 }
 0x1ec   :  { %5936 = vmatmul.mubr.msk.f32.vlgmr.msra.gmra.mxu0 %vm3260_vm1, %v892_v8  ;;  %5947 = vmatmul.mubr.msk.f32.vlgmr.msra.gmra.mxu1 %vm3260_vm1, %v893_v20  ;;  %v522_v46 = vcombine.low %v333_v25, %v345_v51  ;;  %v523_v44 = vcombine.high %v333_v25, %v345_v51  ;;  %v7096_v48 = vrot.slane %v5606_v58, %v6510_v38 }
 0x1ed   :  { %5949 = vmatprep.subr.msk.mxu0 %vm3260_vm1, %v2070_v13  ;;  %5960 = vmatprep.subr.msk.mxu1 %vm3260_vm1, %v2071_v19  ;;  %v7102_v4 = vrot.slane %v5608_v35, %v6510_v38  ;;  %v546_v27 = vrot.slane %v538_v34, %v6510_v38  ;;  %v553_v12 = vrot.slane %v539_v28, %v6510_v38 }
 0x1ee   :  { %5950 = vmatpush3.xpose.msk.msra.mxu0 %vm3260_vm1, %v2070_v13  ;;  %5961 = vmatpush3.xpose.msk.msra.mxu1 %vm3260_vm1, %v2071_v19  ;;  %v530_v25 = vrot.slane %v522_v46, %v6510_v38  ;;  %v537_v37 = vrot.slane %v523_v44, %v6510_v38  ;;  %v7114_v58 = vrot.slane %v5610_v59, %v6510_v38  ;;  %v7168_v13 = vpop.permute.xlu0 %2076 }
 0x1ef   :  { %v7120_v16 = vrot.slane %v5612_v60, %v6510_v38  ;;  %v1882_v17 = vcombine.low %v7096_v48, %v7102_v4  ;;  %2134 = vrot.lane.b32.xlu1 %v6903_v30, %s6354_s13  ;;  %v7880_v31 = vcombine.low %v6821_v6, %v6824_v10  ;;  %v7881_v55 = vcombine.high %v6821_v6, %v6824_v10 }
 0x1f0   :  { %v586_v35 = vcombine.low %v530_v25, %v546_v27  ;;  %v587_v39 = vcombine.high %v530_v25, %v546_v27  ;;  %v602_v60 = vcombine.low %v537_v37, %v553_v12  ;;  %v603_v9 = vcombine.high %v537_v37, %v553_v12 }
 0x1f1   :  { %v7130_v59 = vrot.slane %v7880_v31, %v6510_v38  ;;  %v7136_v56 = vrot.slane %v7881_v55, %v6510_v38  ;;  %v1890_v57 = vrot.slane %v1882_v17, %v6515_v45  ;;  %v1914_v30 = vcombine.low %v7114_v58, %v7120_v16 }
 0x1f2   :  { %v594_v61 = vrot.slane %v586_v35, %v6515_v45  ;;  %v601_v24 = vrot.slane %v587_v39, %v6515_v45  ;;  %v7882_v26 = vcombine.low %v6838_v62, %v6841_v5  ;;  %v7883_v6 = vcombine.high %v6838_v62, %v6841_v5 }
 0x1f3   :  { %v610_v49 = vrot.slane %v602_v60, %v6515_v45  ;;  %v617_v22 = vrot.slane %v603_v9, %v6515_v45  ;;  %v1922_v63 = vrot.slane %v1914_v30, %v6515_v45  ;;  %v1746_v15 = vcombine.low %v7130_v59, %v7136_v56  ;;  %v7218_v60 = vpop.permute.xlu0 %2074 }
 0x1f4   :  { %v7147_v29 = vrot.slane %v7882_v26, %v6510_v38  ;;  %v7153_v10 = vrot.slane %v7883_v6, %v6510_v38  ;;  %v5582_v32 = vcombine.low %v594_v61, %v601_v24  ;;  %v5584_v40 = vcombine.high %v594_v61, %v601_v24  ;;  %v7232_v26 = vpop.permute.xlu1 %2080 }
 0x1f5   :  { %v7166_v62 = vrot.slane %v5590_v7, %v6510_v38  ;;  %v5586_v5 = vcombine.low %v610_v49, %v617_v22  ;;  %v5588_v51 = vcombine.high %v610_v49, %v617_v22  ;;  %v1934_v8 = vcombine.low %v1890_v57, %v1922_v63 }
 0x1f6   :  { %v1778_v41 = vcombine.low %v7147_v29, %v7153_v10  ;;  %v1935_v20 = vcombine.high %v1890_v57, %v1922_v63  ;;  %v7171_v19 = vrot.slane %v5582_v32, %v6510_v38  ;;  %v7174_v34 = vrot.slane %v5584_v40, %v6510_v38 }
 0x1f7   :  { %v1754_v28 = vrot.slane %v1746_v15, %v6515_v45  ;;  %v7179_v44 = vrot.slane %v5586_v5, %v6510_v38  ;;  %v7182_v7 = vrot.slane %v5588_v51, %v6510_v38  ;;  %5951 = vmatprep.subr.msk.mxu0 %vm3260_vm1, %v1934_v8  ;;  %v7190_v27 = vrot.slane %v5592_v54, %v6510_v38 }
 0x1f8   :  { %v1786_v46 = vrot.slane %v1778_v41, %v6515_v45  ;;  %5962 = vmatprep.subr.msk.mxu1 %vm3260_vm1, %v1935_v20  ;;  %v842_v12 = vcombine.low %v7171_v19, %v7174_v34  ;;  %5952 = vmatpush3.xpose.msk.msra.mxu0 %vm3260_vm1, %v1934_v8  ;;  %v7884_v35 = vcombine.low %v6917_v2, %v6920_v50  ;;  %v7246_v8 = vpop.permute.xlu0 %2078 }
 0x1f9   :  { %5963 = vmatpush3.xpose.msk.msra.mxu1 %vm3260_vm1, %v1935_v20  ;;  %v874_v37 = vcombine.low %v7179_v44, %v7182_v7  ;;  %v7209_v3 = vrot.slane %v7885_v18, %v6510_v38  ;;  %v1610_v54 = vcombine.low %v7166_v62, %v7190_v27  ;;  %v706_v31 = vcombine.low %v7075_v1, %v7078_v14 }
 0x1fa   :  { %v1798_v25 = vcombine.low %v1754_v28, %v1786_v46  ;;  %v1799_v17 = vcombine.high %v1754_v28, %v1786_v46  ;;  %v7202_v39 = vrot.slane %v7884_v35, %v6510_v38  ;;  %v738_v55 = vcombine.low %v7083_v42, %v7086_v43 }
 0x1fb   :  { %v2019_v9 = vcombine.high %v7020_v36, %v7029_v47  ;;  %v2051_v2 = vcombine.high %v7038_v21, %v7046_v23  ;;  %v850_v50 = vrot.slane %v842_v12, %v6515_v45  ;;  %v882_v57 = vrot.slane %v874_v37, %v6515_v45 }
 0x1fc   :  { %5953 = vmatprep.subr.msk.mxu0 %vm3260_vm1, %v1798_v25  ;;  %5964 = vmatprep.subr.msk.mxu1 %vm3260_vm1, %v1799_v17  ;;  %v1618_v30 = vrot.slane %v1610_v54, %v6515_v45  ;;  %v1642_v61 = vcombine.low %v7202_v39, %v7209_v3  ;;  %v714_v24 = vrot.slane %v706_v31, %v6515_v45 }
 0x1fd   :  { %5954 = vmatpush3.xpose.msk.msra.mxu0 %vm3260_vm1, %v1798_v25  ;;  %5965 = vmatpush3.xpose.msk.msra.mxu1 %vm3260_vm1, %v1799_v17  ;;  %v746_v36 = vrot.slane %v738_v55, %v6515_v45  ;;  %v2033_v47 = vrot.slane %v2019_v9, %v6515_v45  ;;  %v2065_v23 = vrot.slane %v2051_v2, %v6515_v45 }
 0x1fe   :  { %v1650_v21 = vrot.slane %v1642_v61, %v6515_v45  ;;  %v1883_v6 = vcombine.high %v7096_v48, %v7102_v4  ;;  %v1915_v49 = vcombine.high %v7114_v58, %v7120_v16  ;;  %v894_v15 = vcombine.low %v850_v50, %v882_v57 }
 0x1ff   :  { %v758_v22 = vcombine.low %v714_v24, %v746_v36  ;;  %v759_v63 = vcombine.high %v714_v24, %v746_v36  ;;  %v895_v32 = vcombine.high %v850_v50, %v882_v57  ;;  %v707_v48 = vcombine.high %v7075_v1, %v7078_v14  ;;  %v2085_v16 = vpop.permute.xlu1 %2084 }
 0x200   :  { %v1662_v40 = vcombine.low %v1618_v30, %v1650_v21  ;;  %v1663_v41 = vcombine.high %v1618_v30, %v1650_v21  ;;  %v1897_v5 = vrot.slane %v1883_v6, %v6515_v45  ;;  %v1929_v51 = vrot.slane %v1915_v49, %v6515_v45 }
 0x201   :  { %5957 = vmatprep.mubr.msk.f32.mxu0 %vm3260_vm1, %v758_v22  ;;  %5968 = vmatprep.mubr.msk.f32.mxu1 %vm3260_vm1, %v759_v63  ;;  %v739_v4 = vcombine.high %v7083_v42, %v7086_v43  ;;  %v1747_v58 = vcombine.high %v7130_v59, %v7136_v56  ;;  %v2072_v20 = vcombine.low %v2033_v47, %v2065_v23  ;;  %v2093_v56 = vpop.permute.xlu0 %2092 }
 0x202   :  { %5955 = vmatprep.subr.msk.mxu0 %vm3260_vm1, %v1662_v40  ;;  %5966 = vmatprep.subr.msk.mxu1 %vm3260_vm1, %v1663_v41  ;;  %v2073_v28 = vcombine.high %v2033_v47, %v2065_v23  ;;  %v1779_v46 = vcombine.high %v7147_v29, %v7153_v10  ;;  %v721_v1 = vrot.slane %v707_v48, %v6515_v45 }
 0x203   :  { %5956 = vmatpush3.xpose.msk.msra.mxu0 %vm3260_vm1, %v1662_v40  ;;  %5967 = vmatpush3.xpose.msk.msra.mxu1 %vm3260_vm1, %v1663_v41  ;;  %v753_v14 = vrot.slane %v739_v4, %v6515_v45  ;;  %v1936_v42 = vcombine.low %v1897_v5, %v1929_v51  ;;  %v1761_v43 = vrot.slane %v1747_v58, %v6515_v45  ;;  %v2101_v12 = vpop.permute.xlu1 %2100 }
 0x204   :  { %5971 = vmatprep.subr.msk.mxu0 %vm3260_vm1, %v2072_v20  ;;  %5982 = vmatprep.subr.msk.mxu1 %vm3260_vm1, %v2073_v28  ;;  %v1793_v59 = vrot.slane %v1779_v46, %v6515_v45  ;;  %v1611_v10 = vcombine.high %v7166_v62, %v7190_v27  ;;  %v1643_v25 = vcombine.high %v7202_v39, %v7209_v3 }
 0x205   :  { %v760_v29 = vcombine.low %v721_v1, %v753_v14  ;;  %v1937_v37 = vcombine.high %v1897_v5, %v1929_v51  ;;  %v761_v17 = vcombine.high %v721_v1, %v753_v14  ;;  %v2306_v35 = vcombine.low %v7168_v13, %v2093_v56 }
 0x206   :  { %5958 = vmatmul.mubr.msk.f32.vlgmr.msra.gmra.mxu0 %vm3260_vm1, %v894_v15  ;;  %5969 = vmatmul.mubr.msk.f32.vlgmr.msra.gmra.mxu1 %vm3260_vm1, %v895_v32  ;;  %v2307_v18 = vcombine.high %v7168_v13, %v2093_v56  ;;  %v2322_v54 = vcombine.low %v2085_v16, %v2101_v12  ;;  %v1800_v62 = vcombine.low %v1761_v43, %v1793_v59 }
 0x207   :  { %5972 = vmatpush3.xpose.msk.msra.mxu0 %vm3260_vm1, %v2072_v20  ;;  %5983 = vmatpush3.xpose.msk.msra.mxu1 %vm3260_vm1, %v2073_v28  ;;  %v1801_v27 = vcombine.high %v1761_v43, %v1793_v59  ;;  %v2323_v39 = vcombine.high %v2085_v16, %v2101_v12  ;;  %v1625_v3 = vrot.slane %v1611_v10, %v6515_v45 }
 0x208   :  { %5973 = vmatprep.subr.msk.mxu0 %vm3260_vm1, %v1936_v42  ;;  %5979 = vmatprep.mubr.msk.f32.mxu0 %vm3260_vm1, %v760_v29  ;;  %v1657_v31 = vrot.slane %v1643_v25, %v6515_v45  ;;  %v2314_v55 = vrot.slane %v2306_v35, %v6510_v38  ;;  %v2330_v9 = vrot.slane %v2322_v54, %v6510_v38 }
 0x209   :  { %5984 = vmatprep.subr.msk.mxu1 %vm3260_vm1, %v1937_v37  ;;  %5990 = vmatprep.mubr.msk.f32.mxu1 %vm3260_vm1, %v761_v17  ;;  %v843_v2 = vcombine.high %v7171_v19, %v7174_v34  ;;  %v2321_v13 = vrot.slane %v2307_v18, %v6510_v38  ;;  %v2337_v50 = vrot.slane %v2323_v39, %v6510_v38 }
 0x20a   :  { %v875_v57 = vcombine.high %v7179_v44, %v7182_v7  ;;  %v2370_v30 = vcombine.low %v2314_v55, %v2330_v9  ;;  %v2371_v61 = vcombine.high %v2314_v55, %v2330_v9  ;;  %v1664_v19 = vcombine.low %v1625_v3, %v1657_v31 }
 0x20b   :  { %5974 = vmatpush3.xpose.msk.msra.mxu0 %vm3260_vm1, %v1936_v42  ;;  %5985 = vmatpush3.xpose.msk.msra.mxu1 %vm3260_vm1, %v1937_v37  ;;  %v2386_v24 = vcombine.low %v2321_v13, %v2337_v50  ;;  %v2387_v36 = vcombine.high %v2321_v13, %v2337_v50  ;;  %v1665_v34 = vcombine.high %v1625_v3, %v1657_v31 }
 0x20c   :  { %5975 = vmatprep.subr.msk.mxu0 %vm3260_vm1, %v1800_v62  ;;  %5986 = vmatprep.subr.msk.mxu1 %vm3260_vm1, %v1801_v27  ;;  %v2378_v47 = vrot.slane %v2370_v30, %v6515_v45  ;;  %v2385_v21 = vrot.slane %v2371_v61, %v6515_v45  ;;  %v857_v44 = vrot.slane %v843_v2, %v6515_v45 }
 0x20d   :  { %v2394_v7 = vrot.slane %v2386_v24, %v6515_v45  ;;  %v2401_v23 = vrot.slane %v2387_v36, %v6515_v45  ;;  %v889_v6 = vrot.slane %v875_v57, %v6515_v45 }
 0x20e   :  { %v5629_v49 = vcombine.low %v2378_v47, %v2385_v21  ;;  %v5631_v22 = vcombine.high %v2378_v47, %v2385_v21 }
 0x20f   :  { %5976 = vmatpush3.xpose.msk.msra.mxu0 %vm3260_vm1, %v1800_v62  ;;  %5987 = vmatpush3.xpose.msk.msra.mxu1 %vm3260_vm1, %v1801_v27  ;;  %v5633_v63 = vcombine.low %v2394_v7, %v2401_v23  ;;  %v5635_v15 = vcombine.high %v2394_v7, %v2401_v23  ;;  %v896_v51 = vcombine.low %v857_v44, %v889_v6 }
 0x210   :  { %5977 = vmatprep.subr.msk.mxu0 %vm3260_vm1, %v1664_v19  ;;  %5988 = vmatprep.subr.msk.mxu1 %vm3260_vm1, %v1665_v34  ;;  %v2858_v32 = vrot.slane %v5629_v49, %v6510_v38  ;;  %v2874_v40 = vrot.slane %v5631_v22, %v6510_v38  ;;  %v897_v48 = vcombine.high %v857_v44, %v889_v6 }
 0x211   :  { %v2890_v41 = vrot.slane %v5633_v63, %v6510_v38  ;;  %v2906_v5 = vrot.slane %v5635_v15, %v6510_v38 }
 0x212   :  { %v2914_v4 = vcombine.low %v2858_v32, %v2874_v40  ;;  %v2915_v58 = vcombine.high %v2858_v32, %v2874_v40 }
 0x213   :  { %5978 = vmatpush3.xpose.msk.msra.mxu0 %vm3260_vm1, %v1664_v19  ;;  %5989 = vmatpush3.xpose.msk.msra.mxu1 %vm3260_vm1, %v1665_v34  ;;  %v2946_v16 = vcombine.low %v2890_v41, %v2906_v5  ;;  %v2947_v20 = vcombine.high %v2890_v41, %v2906_v5 }
 0x214   :  { %v7313_v28 = vrot.slane %v2914_v4, %v6515_v45  ;;  %v7316_v46 = vrot.slane %v2915_v58, %v6515_v45 }
 0x215   :  { %v7319_v1 = vrot.slane %v2946_v16, %v6515_v45  ;;  %v7322_v14 = vrot.slane %v2947_v20, %v6515_v45 }
 0x216   :  { %5980 = vmatmul.mubr.msk.f32.vlgmr.msra.gmra.mxu0 %vm3260_vm1, %v896_v51  ;;  %5991 = vmatmul.mubr.msk.f32.vlgmr.msra.gmra.mxu1 %vm3260_vm1, %v897_v48 }
 0x217   :  { %v7326_v42 = vcombine.high %v7313_v28, %v7319_v1  ;;  %v7330_v43 = vcombine.high %v7316_v46, %v7322_v14 }
 0x22b   :  { %v7332_v59 = vpop.permute.xlu1 %2116  ;;  %v7334_v56 = vpop.permute.xlu0 %2108 }
 0x22f   :  { %v2083_v12 = vpop.permute.xlu1 %2082 }
 0x230   :  { %v2091_v29 = vpop.permute.xlu0 %2090 }
 0x231   :  { %v2170_v10 = vcombine.low %v7218_v60, %v2091_v29  ;;  %v2171_v25 = vcombine.high %v7218_v60, %v2091_v29 }
 0x233   :  { %v2099_v37 = vpop.permute.xlu1 %2098  ;;  %v2178_v18 = vrot.slane %v2170_v10, %v6510_v38  ;;  %v2185_v54 = vrot.slane %v2171_v25, %v6510_v38 }
 0x234   :  { %v2186_v17 = vcombine.low %v2083_v12, %v2099_v37  ;;  %v2187_v35 = vcombine.high %v2083_v12, %v2099_v37  ;;  %v2089_v47 = vpop.permute.xlu0 %2088 }
 0x236   :  { %v2194_v62 = vrot.slane %v2186_v17, %v6510_v38  ;;  %v2201_v27 = vrot.slane %v2187_v35, %v6510_v38 }
 0x237   :  { %v2097_v39 = vpop.permute.xlu1 %2096 }
 0x238   :  { %v2234_v3 = vcombine.low %v2178_v18, %v2194_v62  ;;  %v2235_v31 = vcombine.high %v2178_v18, %v2194_v62  ;;  %v2250_v55 = vcombine.low %v2185_v54, %v2201_v27  ;;  %v2251_v9 = vcombine.high %v2185_v54, %v2201_v27 }
 0x239   :  { %v2578_v57 = vcombine.low %v7232_v26, %v2097_v39  ;;  %v2579_v30 = vcombine.high %v7232_v26, %v2097_v39 }
 0x23a   :  { %v2242_v2 = vrot.slane %v2234_v3, %v6515_v45  ;;  %v2249_v60 = vrot.slane %v2235_v31, %v6515_v45  ;;  %v2258_v13 = vrot.slane %v2250_v55, %v6515_v45  ;;  %v2265_v50 = vrot.slane %v2251_v9, %v6515_v45 }
 0x23b   :  { %v2105_v61 = vpop.permute.xlu1 %2104  ;;  %v2586_v22 = vrot.slane %v2578_v57, %v6510_v38  ;;  %v2593_v26 = vrot.slane %v2579_v30, %v6510_v38  ;;  %v2121_v57 = vpop.permute.xlu0 %2120 }
 0x23c   :  { %v5621_v24 = vcombine.low %v2242_v2, %v2249_v60  ;;  %v5623_v36 = vcombine.high %v2242_v2, %v2249_v60  ;;  %v5625_v19 = vcombine.low %v2258_v13, %v2265_v50  ;;  %v5627_v34 = vcombine.high %v2258_v13, %v2265_v50 }
 0x23d   :  { %v2594_v21 = vcombine.low %v2089_v47, %v2105_v61  ;;  %v2595_v44 = vcombine.high %v2089_v47, %v2105_v61 }
 0x23e   :  { %v2722_v7 = vrot.slane %v5621_v24, %v6510_v38  ;;  %v2738_v23 = vrot.slane %v5623_v36, %v6510_v38  ;;  %v2754_v6 = vrot.slane %v5625_v19, %v6510_v38  ;;  %v2770_v49 = vrot.slane %v5627_v34, %v6510_v38 }
 0x23f   :  { %v2602_v63 = vrot.slane %v2594_v21, %v6510_v38  ;;  %v2609_v15 = vrot.slane %v2595_v44, %v6510_v38  ;;  %v2113_v4 = vpop.permute.xlu1 %2112 }
 0x240   :  { %v2778_v32 = vcombine.low %v2722_v7, %v2738_v23  ;;  %v2810_v40 = vcombine.low %v2754_v6, %v2770_v49  ;;  %v2779_v25 = vcombine.high %v2722_v7, %v2738_v23  ;;  %v2811_v37 = vcombine.high %v2754_v6, %v2770_v49 }
 0x241   :  { %v2642_v41 = vcombine.low %v2586_v22, %v2602_v63  ;;  %v2643_v5 = vcombine.high %v2586_v22, %v2602_v63  ;;  %v2658_v51 = vcombine.low %v2593_v26, %v2609_v15  ;;  %v2659_v48 = vcombine.high %v2593_v26, %v2609_v15 }
 0x242   :  { %v7357_v58 = vrot.slane %v2778_v32, %v6515_v45  ;;  %v7360_v16 = vrot.slane %v2810_v40, %v6515_v45  ;;  %v7371_v27 = vrot.slane %v2779_v25, %v6515_v45  ;;  %v7374_v39 = vrot.slane %v2811_v37, %v6515_v45  ;;  %v2095_v40 = vpop.permute.xlu0 %2094 }
 0x243   :  { %v2650_v20 = vrot.slane %v2642_v41, %v6515_v45  ;;  %v2657_v12 = vrot.slane %v2643_v5, %v6515_v45  ;;  %v2666_v29 = vrot.slane %v2658_v51, %v6515_v45  ;;  %v2673_v10 = vrot.slane %v2659_v48, %v6515_v45  ;;  %v2129_v3 = vpop.permute.xlu1 %2128 }
 0x244   :  { %v7368_v17 = vcombine.high %v7357_v58, %v7360_v16  ;;  %v2610_v60 = vcombine.low %v2113_v4, %v2129_v3  ;;  %v2611_v13 = vcombine.high %v2113_v4, %v2129_v3  ;;  %v7382_v50 = vcombine.high %v7371_v27, %v7374_v39 }
 0x245   :  { %v5645_v35 = vcombine.low %v2650_v20, %v2657_v12  ;;  %v5647_v18 = vcombine.high %v2650_v20, %v2657_v12  ;;  %v5649_v54 = vcombine.low %v2666_v29, %v2673_v10  ;;  %v5651_v62 = vcombine.high %v2666_v29, %v2673_v10 }
 0x246   :  { %v2618_v6 = vrot.slane %v2610_v60, %v6510_v38  ;;  %v2625_v49 = vrot.slane %v2611_v13, %v6510_v38  ;;  %v2111_v3 = vpop.permute.xlu0 %2110 }
 0x247   :  { %v3130_v31 = vrot.slane %v5645_v35, %v6510_v38  ;;  %v3146_v55 = vrot.slane %v5647_v18, %v6510_v38  ;;  %v3162_v9 = vrot.slane %v5649_v54, %v6510_v38  ;;  %v3178_v2 = vrot.slane %v5651_v62, %v6510_v38 }
 0x248   :  { %v2442_v54 = vcombine.low %v7246_v8, %v2095_v40  ;;  %v2443_v62 = vcombine.high %v7246_v8, %v2095_v40 }
 0x249   :  { %v3186_v30 = vcombine.low %v3130_v31, %v3146_v55  ;;  %v3218_v61 = vcombine.low %v3162_v9, %v3178_v2  ;;  %v3187_v24 = vcombine.high %v3130_v31, %v3146_v55  ;;  %v3219_v36 = vcombine.high %v3162_v9, %v3178_v2 }
 0x24a   :  { %v2457_v8 = vrot.slane %v2443_v62, %v6510_v38 }
 0x24b   :  { %v2137_v19 = vpop.permute.xlu1 %2136  ;;  %v7385_v34 = vrot.slane %v3186_v30, %v6515_v45  ;;  %v7388_v47 = vrot.slane %v3218_v61, %v6515_v45  ;;  %v3201_v7 = vrot.slane %v3187_v24, %v6515_v45  ;;  %v3233_v23 = vrot.slane %v3219_v36, %v6515_v45 }
 0x24c   :  { %v2626_v21 = vcombine.low %v2121_v57, %v2137_v19  ;;  %v2627_v44 = vcombine.high %v2121_v57, %v2137_v19  ;;  %v2450_v19 = vrot.slane %v2442_v54, %v6510_v38 }
 0x24d   :  { %v3250_v22 = vcombine.low %v7385_v34, %v7388_v47  ;;  %v3252_v15 = vcombine.low %v3201_v7, %v3233_v23  ;;  %v7398_v32 = vcombine.high %v3201_v7, %v3233_v23 }
 0x24e   :  { %v2634_v26 = vrot.slane %v2626_v21, %v6510_v38  ;;  %v2641_v63 = vrot.slane %v2627_v44, %v6510_v38 }
 0x24f   :  { %5993 = vmatprep.subr.mxu1 %v3250_v22  ;;  %6015 = vmatprep.subr.mxu0 %v3252_v15 }
 0x250   :  { %v2674_v41 = vcombine.low %v2618_v6, %v2634_v26  ;;  %v2675_v5 = vcombine.high %v2618_v6, %v2634_v26  ;;  %v2690_v51 = vcombine.low %v2625_v49, %v2641_v63  ;;  %v2691_v48 = vcombine.high %v2625_v49, %v2641_v63  ;;  %5994 = vmatpush3.msra.mxu1 %v3250_v22  ;;  %v2127_v26 = vpop.permute.xlu0 %2126 }
 0x251   :  { %v2087_v4 = vpop.permute.xlu1 %2086  ;;  %6016 = vmatpush3.msra.mxu0 %v3252_v15 }
 0x252   :  { %v2682_v20 = vrot.slane %v2674_v41, %v6515_v45  ;;  %v2689_v12 = vrot.slane %v2675_v5, %v6515_v45  ;;  %v2698_v29 = vrot.slane %v2690_v51, %v6515_v45  ;;  %v2705_v10 = vrot.slane %v2691_v48, %v6515_v45 }
 0x254   :  { %v5646_v25 = vcombine.low %v2682_v20, %v2689_v12  ;;  %v5648_v37 = vcombine.high %v2682_v20, %v2689_v12  ;;  %v5650_v35 = vcombine.low %v2698_v29, %v2705_v10  ;;  %v5652_v18 = vcombine.high %v2698_v29, %v2705_v10 }
 0x255   :  { %v2474_v10 = vcombine.low %v2111_v3, %v2127_v26 }
 0x256   :  { %v2103_v31 = vpop.permute.xlu1 %2102  ;;  %v3137_v55 = vrot.slane %v5646_v25, %v6510_v38  ;;  %v3153_v9 = vrot.slane %v5648_v37, %v6510_v38  ;;  %v3169_v2 = vrot.slane %v5650_v35, %v6510_v38  ;;  %v3185_v60 = vrot.slane %v5652_v18, %v6510_v38 }
 0x257   :  { %v2458_v13 = vcombine.low %v2087_v4, %v2103_v31  ;;  %v2459_v57 = vcombine.high %v2087_v4, %v2103_v31  ;;  %v2475_v25 = vcombine.high %v2111_v3, %v2127_v26 }
 0x258   :  { %v3202_v30 = vcombine.low %v3137_v55, %v3153_v9  ;;  %v3234_v61 = vcombine.low %v3169_v2, %v3185_v60  ;;  %v3203_v24 = vcombine.high %v3137_v55, %v3153_v9  ;;  %v3235_v36 = vcombine.high %v3169_v2, %v3185_v60 }
 0x259   :  { %v2466_v21 = vrot.slane %v2458_v13, %v6510_v38  ;;  %v2473_v44 = vrot.slane %v2459_v57, %v6510_v38  ;;  %v2482_v57 = vrot.slane %v2474_v10, %v6510_v38 }
 0x25a   :  { %v7415_v23 = vrot.slane %v3202_v30, %v6515_v45  ;;  %v7418_v6 = vrot.slane %v3234_v61, %v6515_v45  ;;  %v3217_v49 = vrot.slane %v3203_v24, %v6515_v45  ;;  %v3249_v22 = vrot.slane %v3235_v36, %v6515_v45 }
 0x25b   :  { %v2119_v7 = vpop.permute.xlu1 %2118  ;;  %v2506_v63 = vcombine.low %v2450_v19, %v2466_v21  ;;  %v2507_v15 = vcombine.high %v2450_v19, %v2466_v21  ;;  %v2522_v40 = vcombine.low %v2457_v8, %v2473_v44  ;;  %v2523_v41 = vcombine.high %v2457_v8, %v2473_v44 }
 0x25c   :  { %v7424_v5 = vcombine.high %v7415_v23, %v7418_v6  ;;  %v7426_v51 = vcombine.high %v3217_v49, %v3249_v22  ;;  %v7428_v48 = vcombine.low %v3217_v49, %v3249_v22  ;;  %v2489_v30 = vrot.slane %v2475_v25, %v6510_v38 }
 0x25d   :  { %v2514_v4 = vrot.slane %v2506_v63, %v6515_v45  ;;  %v2521_v20 = vrot.slane %v2507_v15, %v6515_v45  ;;  %v2530_v12 = vrot.slane %v2522_v40, %v6515_v45  ;;  %v2537_v29 = vrot.slane %v2523_v41, %v6515_v45 }
 0x25f   :  { %v5637_v37 = vcombine.low %v2514_v4, %v2521_v20  ;;  %v5639_v35 = vcombine.high %v2514_v4, %v2521_v20  ;;  %v5641_v18 = vcombine.low %v2530_v12, %v2537_v29  ;;  %v5643_v54 = vcombine.high %v2530_v12, %v2537_v29 }
 0x261   :  { %v2135_v62 = vpop.permute.xlu1 %2134  ;;  %v2994_v9 = vrot.slane %v5637_v37, %v6510_v38  ;;  %v3010_v2 = vrot.slane %v5639_v35, %v6510_v38  ;;  %v3026_v60 = vrot.slane %v5641_v18, %v6510_v38  ;;  %v3042_v13 = vrot.slane %v5643_v54, %v6510_v38 }
 0x262   :  { %v2490_v31 = vcombine.low %v2119_v7, %v2135_v62  ;;  %v2491_v55 = vcombine.high %v2119_v7, %v2135_v62  ;;  %v2978_v62 = vcombine.low %v7313_v28, %v7319_v1 }
 0x263   :  { %v3050_v24 = vcombine.low %v2994_v9, %v3010_v2  ;;  %v3082_v36 = vcombine.low %v3026_v60, %v3042_v13  ;;  %v3051_v19 = vcombine.high %v2994_v9, %v3010_v2  ;;  %v3083_v8 = vcombine.high %v3026_v60, %v3042_v13 }
 0x264   :  { %v2498_v3 = vrot.slane %v2490_v31, %v6510_v38  ;;  %v2505_v61 = vrot.slane %v2491_v55, %v6510_v38  ;;  %v2980_v31 = vcombine.low %v7316_v46, %v7322_v14  ;;  %v2842_v60 = vcombine.low %v7357_v58, %v7360_v16 }
 0x265   :  { %v3058_v22 = vrot.slane %v3050_v24, %v6515_v45  ;;  %v3090_v26 = vrot.slane %v3082_v36, %v6515_v45  ;;  %v3065_v63 = vrot.slane %v3051_v19, %v6515_v45  ;;  %v3097_v15 = vrot.slane %v3083_v8, %v6515_v45  ;;  %v3258_v19 = vld [vmem:[#allocation7] sm:$0xff] }
 0x266   :  { %v2538_v21 = vcombine.low %v2482_v57, %v2498_v3  ;;  %v2539_v44 = vcombine.high %v2482_v57, %v2498_v3  ;;  %v2554_v7 = vcombine.low %v2489_v30, %v2505_v61  ;;  %v2555_v49 = vcombine.high %v2489_v30, %v2505_v61  ;;  %v3259_v61 = vld [vmem:[#allocation7 + $0x8] sm:$0xff] }
 0x267   :  { %v3114_v12 = vcombine.low %v3058_v22, %v3090_v26  ;;  %v3116_v29 = vcombine.low %v3065_v63, %v3097_v15  ;;  %v7450_v10 = vcombine.high %v3058_v22, %v3090_v26  ;;  %v7452_v25 = vcombine.high %v3065_v63, %v3097_v15 }
 0x268   :  { %v2546_v40 = vrot.slane %v2538_v21, %v6515_v45  ;;  %v2553_v41 = vrot.slane %v2539_v44, %v6515_v45  ;;  %v2562_v4 = vrot.slane %v2554_v7, %v6515_v45  ;;  %v2569_v20 = vrot.slane %v2555_v49, %v6515_v45 }
 0x269   :  { %5995 = vmatprep.subr.mxu1 %v3114_v12  ;;  %6017 = vmatprep.subr.mxu0 %v3116_v29  ;;  %v2844_v13 = vcombine.low %v7371_v27, %v7374_v39  ;;  %v7468_v46 = vcombine.high %v7385_v34, %v7388_v47  ;;  %v7472_v57 = vcombine.low %v7415_v23, %v7418_v6 }
 0x26a   :  { %v5638_v37 = vcombine.low %v2546_v40, %v2553_v41  ;;  %v5640_v35 = vcombine.high %v2546_v40, %v2553_v41  ;;  %v5642_v18 = vcombine.low %v2562_v4, %v2569_v20  ;;  %v5644_v54 = vcombine.high %v2562_v4, %v2569_v20  ;;  %5996 = vmatpush3.msra.mxu1 %v3114_v12 }
 0x26b   :  { %6018 = vmatpush3.msra.mxu0 %v3116_v29  ;;  %5997 = vmatprep.subr.mxu1 %v2978_v62 }
 0x26c   :  { %v3001_v55 = vrot.slane %v5638_v37, %v6510_v38  ;;  %v3017_v9 = vrot.slane %v5640_v35, %v6510_v38  ;;  %v3033_v2 = vrot.slane %v5642_v18, %v6510_v38  ;;  %6019 = vmatprep.subr.mxu0 %v2980_v31  ;;  %v3049_v28 = vrot.slane %v5644_v54, %v6510_v38 }
 0x26d   :  { %5998 = vmatpush3.msra.mxu1 %v2978_v62  ;;  %6020 = vmatpush3.msra.mxu0 %v2980_v31 }
 0x26e   :  { %v3066_v1 = vcombine.low %v3001_v55, %v3017_v9  ;;  %v3067_v14 = vcombine.high %v3001_v55, %v3017_v9  ;;  %5999 = vmatprep.subr.mxu1 %v2842_v60  ;;  %6021 = vmatprep.subr.mxu0 %v2844_v13  ;;  %v3098_v58 = vcombine.low %v3033_v2, %v3049_v28 }
 0x26f   :  { %v3099_v16 = vcombine.high %v3033_v2, %v3049_v28  ;;  %6000 = vmatpush3.msra.mxu1 %v2842_v60  ;;  %6022 = vmatpush3.msra.mxu0 %v2844_v13 }
 0x270   :  { %v3074_v27 = vrot.slane %v3066_v1, %v6515_v45  ;;  %v3081_v39 = vrot.slane %v3067_v14, %v6515_v45  ;;  %6004 = vmatprep.subr.mxu1 %v7468_v46  ;;  %6037 = vmatprep.subr.mxu0 %v7472_v57  ;;  %v3106_v34 = vrot.slane %v3098_v58, %v6515_v45 }
 0x271   :  { %v3113_v47 = vrot.slane %v3099_v16, %v6515_v45 }
 0x272   :  { %v7480_v30 = vcombine.high %v3074_v27, %v3106_v34  ;;  %v7484_v6 = vcombine.low %v3074_v27, %v3106_v34 }
 0x273   :  { %v7482_v23 = vcombine.high %v3081_v39, %v3113_v47  ;;  %v7486_v3 = vcombine.low %v3081_v39, %v3113_v47 }
 0x297   :  { %v5915_v24 = vpop.f32.mrf.mxu0  ;;  %v5926_v36 = vpop.f32.mrf.mxu1 }
 0x298   :  { %v7488_v8 = vadd.f32 %v5915_v24, %v3259_v61  ;;  %v7490_v21 = vadd.f32 %v5926_v36, %v3259_v61 }
 0x299   :  { %v3345_v44 = vpop.f32.mrf.mxu0  ;;  %v3438_v26 = vpop.f32.mrf.mxu1 }
 0x29a   :  { %v7492_v7 = vadd.f32 %v3345_v44, %v3258_v19  ;;  %v4009_v49 = vsel %vm4005_vm2, %v7488_v8, -inf  ;;  %v4015_v22 = vsel %vm4005_vm2, %v7490_v21, -inf  ;;  %v7498_v63 = vadd.f32 %v3438_v26, %v3258_v19 }
 0x29b   :  { %4010 = vmax.xlane.f32.xlu1 %v4009_v49  ;;  %4016 = vmax.xlane.f32.xlu0 %v4015_v22 }
 0x29c   :  { %v4006_v15 = vsel %vm4005_vm2, %v7492_v7, -inf  ;;  %v4012_v40 = vsel %vm4005_vm2, %v7498_v63, -inf }
 0x29f   :  { %4007 = vmax.xlane.f32.xlu0 %v4006_v15 }
 0x2a3   :  { %4013 = vmax.xlane.f32.xlu0 %v4012_v40 }
 0x2ac   :  { %v5937_v41 = vpop.f32.mrf.mxu0  ;;  %v5948_v4 = vpop.f32.mrf.mxu1 }
 0x2ad   :  { %v7504_v20 = vadd.f32 %v5937_v41, %v3259_v61  ;;  %v7506_v12 = vadd.f32 %v5948_v4, %v3259_v61 }
 0x2ae   :  { %v3531_v29 = vpop.f32.mrf.mxu0  ;;  %v3624_v37 = vpop.f32.mrf.mxu1 }
 0x2af   :  { %v7508_v35 = vadd.f32 %v3531_v29, %v3258_v19  ;;  %v7510_v18 = vadd.f32 %v3624_v37, %v3258_v19  ;;  %v4021_v54 = vsel %vm4005_vm2, %v7504_v20, -inf  ;;  %v4027_v62 = vsel %vm4005_vm2, %v7506_v12, -inf }
 0x2b0   :  { %4022 = vmax.xlane.f32.xlu1 %v4021_v54  ;;  %4028 = vmax.xlane.f32.xlu0 %v4027_v62 }
 0x2b1   :  { %v4018_v31 = vsel %vm4005_vm2, %v7508_v35, -inf  ;;  %v4024_v55 = vsel %vm4005_vm2, %v7510_v18, -inf }
 0x2b4   :  { %4019 = vmax.xlane.f32.xlu1 %v4018_v31  ;;  %4025 = vmax.xlane.f32.xlu0 %v4024_v55 }
 0x2c6   :  { %v5959_v9 = vpop.f32.mrf.mxu0  ;;  %v5970_v2 = vpop.f32.mrf.mxu1 }
 0x2c7   :  { %v7520_v60 = vadd.f32 %v5959_v9, %v3259_v61  ;;  %v7522_v13 = vadd.f32 %v5970_v2, %v3259_v61 }
 0x2c8   :  { %v3717_v28 = vpop.f32.mrf.mxu0  ;;  %v3810_v1 = vpop.f32.mrf.mxu1 }
 0x2c9   :  { %v7524_v14 = vadd.f32 %v3717_v28, %v3258_v19  ;;  %v7526_v58 = vadd.f32 %v3810_v1, %v3258_v19  ;;  %v4039_v16 = vsel %vm4005_vm2, %v7522_v13, -inf  ;;  %v4033_v27 = vsel %vm4005_vm2, %v7520_v60, -inf }
 0x2ca   :  { %4040 = vmax.xlane.f32.xlu0 %v4039_v16  ;;  %4034 = vmax.xlane.f32.xlu1 %v4033_v27 }
 0x2cb   :  { %v4036_v39 = vsel %vm4005_vm2, %v7526_v58, -inf  ;;  %v4030_v34 = vsel %vm4005_vm2, %v7524_v14, -inf }
 0x2ce   :  { %4037 = vmax.xlane.f32.xlu0 %v4036_v39  ;;  %4031 = vmax.xlane.f32.xlu1 %v4030_v34 }
 0x2d6   :  { %v5981_v47 = vpop.f32.mrf.mxu0  ;;  %v5992_v24 = vpop.f32.mrf.mxu1 }
 0x2d7   :  { %v7536_v36 = vadd.f32 %v5981_v47, %v3259_v61  ;;  %v7538_v44 = vadd.f32 %v5992_v24, %v3259_v61 }
 0x2d8   :  { %v3903_v49 = vpop.f32.mrf.mxu0  ;;  %v3996_v22 = vpop.f32.mrf.mxu1 }
 0x2d9   :  { %v7540_v26 = vadd.f32 %v3903_v49, %v3258_v19  ;;  %v7542_v15 = vadd.f32 %v3996_v22, %v3258_v19  ;;  %v4051_v40 = vsel %vm4005_vm2, %v7538_v44, -inf  ;;  %v4045_v41 = vsel %vm4005_vm2, %v7536_v36, -inf }
 0x2da   :  { %4052 = vmax.xlane.f32.xlu0 %v4051_v40  ;;  %4046 = vmax.xlane.f32.xlu1 %v4045_v41 }
 0x2db   :  { %v4048_v4 = vsel %vm4005_vm2, %v7542_v15, -inf  ;;  %v4042_v61 = vsel %vm4005_vm2, %v7540_v26, -inf }
 0x2de   :  { %4049 = vmax.xlane.f32.xlu0 %v4048_v4  ;;  %4043 = vmax.xlane.f32.xlu1 %v4042_v61 }
 0x2ef   :  { %2132 = vrot.lane.b32.xlu1 %v6742_v52, %s6354_s13 }
 0x2f3   :  { %2114 = vrot.lane.b32.xlu1 %v6779_v33, %s6354_s13 }
 0x2f4   :  { %2124 = vrot.lane.b32.xlu0 %v6744_v53, %s6354_s13 }
 0x2f8   :  { %2106 = vrot.lane.b32.xlu0 %v6781_v11, %s6354_s13 }
 0x2fc   :  { %2122 = vrot.lane.b32.xlu0 %v6812_v0, %s6354_s13 }
 0x324   :  { %v4011_v19 = vpop.xlane.xlu1 %4010  ;;  %v4017_v29 = vpop.xlane.xlu0 %4016 }
 0x325   :  { %v4055_v37 = vsub.f32 %v7488_v8, %v4011_v19  ;;  %v4057_v54 = vsub.f32 %v7490_v21, %v4017_v29 }
 0x327   :  { %v4072_v62 = vmul.f32 1.442695, %v4055_v37  ;;  %v4076_v52 = vmul.f32 1.442695, %v4057_v54 }
 0x328   :  { %v4008_v31 = vpop.xlane.xlu0 %4007 }
 0x329   :  { %6125 = vpow2.f32 %v4072_v62  ;;  %v4054_v33 = vsub.f32 %v7492_v7, %v4008_v31 }
 0x32a   :  { %6127 = vpow2.f32 %v4076_v52 }
 0x32b   :  { %v4070_v53 = vmul.f32 1.442695, %v4054_v33 }
 0x32c   :  { %v4014_v55 = vpop.xlane.xlu0 %4013 }
 0x32d   :  { %6129 = vpow2.f32 %v4070_v53  ;;  %v4056_v11 = vsub.f32 %v7498_v63, %v4014_v55 }
 0x32f   :  { %v4074_v9 = vmul.f32 1.442695, %v4056_v11 }
 0x331   :  { %6131 = vpow2.f32 %v4074_v9 }
 0x336   :  { %v7566_v0 = vpop.eup %6125 }
 0x337   :  { %v7568_v2 = vpop.eup %6127  ;;  %v4105_v8 = vsel %vm4005_vm2, %v7566_v0, 0.0 }
 0x338   :  { %4106 = vadd.xlane.f32.xlu0 %v4105_v8  ;;  %v4111_v7 = vsel %vm4005_vm2, %v7568_v2, 0.0 }
 0x339   :  { %v4023_v21 = vpop.xlane.xlu1 %4022  ;;  %v4029_v28 = vpop.xlane.xlu0 %4028  ;;  %4112 = vadd.xlane.f32.xlu1 %v4111_v7 }
 0x33a   :  { %v4061_v1 = vsub.f32 %v7506_v12, %v4029_v28  ;;  %v7575_v16 = vpop.eup %6129  ;;  %v4059_v53 = vsub.f32 %v7504_v20, %v4023_v21 }
 0x33b   :  { %v4102_v27 = vsel %vm4005_vm2, %v7575_v16, 0.0 }
 0x33c   :  { %v4084_v63 = vmul.f32 1.442695, %v4061_v1  ;;  %v4080_v11 = vmul.f32 1.442695, %v4059_v53 }
 0x33d   :  { %v4020_v39 = vpop.xlane.xlu1 %4019  ;;  %v4026_v34 = vpop.xlane.xlu0 %4025  ;;  %4103 = vadd.xlane.f32.xlu1 %v4102_v27 }
 0x33e   :  { %v4058_v47 = vsub.f32 %v7508_v35, %v4020_v39  ;;  %v4060_v24 = vsub.f32 %v7510_v18, %v4026_v34  ;;  %v7581_v49 = vpop.eup %6131  ;;  %6133 = vpow2.f32 %v4084_v63  ;;  %v7886_v18 = vld [vmem:[#allocation19_spill] sm:$0xff] }
 0x33f   :  { %v4108_v12 = vsel %vm4005_vm2, %v7581_v49, 0.0 }
 0x340   :  { %v4078_v22 = vmul.f32 1.442695, %v4058_v47  ;;  %v4082_v40 = vmul.f32 1.442695, %v4060_v24  ;;  %4109 = vadd.xlane.f32.xlu0 %v4108_v12 }
 0x342   :  { %6135 = vpow2.f32 %v4078_v22 }
 0x343   :  { %6137 = vpow2.f32 %v4082_v40 }
 0x34b   :  { %v7585_v41 = vpop.eup %6133 }
 0x34c   :  { %v4123_v4 = vsel %vm4005_vm2, %v7585_v41, 0.0 }
 0x34d   :  { %4124 = vadd.xlane.f32.xlu0 %v4123_v4 }
 0x34e   :  { %2130 = vrot.lane.b32.xlu1 %v7886_v18, %s6354_s13 }
 0x34f   :  { %v7589_v35 = vpop.eup %6135 }
 0x350   :  { %v4114_v61 = vsel %vm4005_vm2, %v7589_v35, 0.0  ;;  %v7595_v19 = vpop.eup %6137 }
 0x351   :  { %4115 = vadd.xlane.f32.xlu0 %v4114_v61  ;;  %v4120_v54 = vsel %vm4005_vm2, %v7595_v19, 0.0 }
 0x353   :  { %v4041_v29 = vpop.xlane.xlu0 %4040  ;;  %v4035_v33 = vpop.xlane.xlu1 %4034 }
 0x354   :  { %v4065_v37 = vsub.f32 %v7522_v13, %v4041_v29  ;;  %v4063_v9 = vsub.f32 %v7520_v60, %v4035_v33 }
 0x355   :  { %4121 = vadd.xlane.f32.xlu0 %v4120_v54 }
 0x356   :  { %v4092_v62 = vmul.f32 1.442695, %v4065_v37  ;;  %v4088_v13 = vmul.f32 1.442695, %v4063_v9 }
 0x357   :  { %v4038_v52 = vpop.xlane.xlu0 %4037  ;;  %v4032_v8 = vpop.xlane.xlu1 %4031 }
 0x358   :  { %v4064_v31 = vsub.f32 %v7526_v58, %v4038_v52  ;;  %6139 = vpow2.f32 %v4092_v62  ;;  %v4062_v28 = vsub.f32 %v7524_v14, %v4032_v8 }
 0x35a   :  { %v4090_v55 = vmul.f32 1.442695, %v4064_v31  ;;  %v4086_v58 = vmul.f32 1.442695, %v4062_v28 }
 0x35c   :  { %6141 = vpow2.f32 %v4090_v55 }
 0x35d   :  { %6143 = vpow2.f32 %v4080_v11 }
 0x35e   :  { %6145 = vpow2.f32 %v4088_v13 }
 0x35f   :  { %6147 = vpow2.f32 %v4086_v58 }
 0x363   :  { %v4047_v7 = vpop.xlane.xlu1 %4046  ;;  %v4053_v1 = vpop.xlane.xlu0 %4052 }
 0x364   :  { %v4067_v63 = vsub.f32 %v7536_v36, %v4047_v7  ;;  %v4069_v36 = vsub.f32 %v7538_v44, %v4053_v1 }
 0x365   :  { %v7605_v27 = vpop.eup %6139 }
 0x366   :  { %v4135_v21 = vsel %vm4005_vm2, %v7605_v27, 0.0  ;;  %v4096_v47 = vmul.f32 1.442695, %v4067_v63  ;;  %v4100_v40 = vmul.f32 1.442695, %v4069_v36 }
 0x367   :  { %v4044_v39 = vpop.xlane.xlu1 %4043  ;;  %v4050_v20 = vpop.xlane.xlu0 %4049  ;;  %4136 = vadd.xlane.f32.xlu0 %v4135_v21 }
 0x368   :  { %v4066_v60 = vsub.f32 %v7540_v26, %v4044_v39  ;;  %v4068_v34 = vsub.f32 %v7542_v15, %v4050_v20 }
 0x369   :  { %v7611_v14 = vpop.eup %6141 }
 0x36a   :  { %v4094_v24 = vmul.f32 1.442695, %v4066_v60  ;;  %v4098_v22 = vmul.f32 1.442695, %v4068_v34  ;;  %v4132_v12 = vsel %vm4005_vm2, %v7611_v14, 0.0  ;;  %v7616_v26 = vpop.eup %6143 }
 0x36b   :  { %4133 = vadd.xlane.f32.xlu0 %v4132_v12  ;;  %v4117_v15 = vsel %vm4005_vm2, %v7616_v26, 0.0  ;;  %v7620_v4 = vpop.eup %6145  ;;  %v2125_v55 = vpop.permute.xlu0 %2124 }
 0x36c   :  { %6149 = vpow2.f32 %v4094_v24  ;;  %v4129_v44 = vsel %vm4005_vm2, %v7620_v4, 0.0  ;;  %v7624_v18 = vpop.eup %6147  ;;  %v2133_v11 = vpop.permute.xlu1 %2132  ;;  %v2338_v20 = vcombine.low %v7334_v56, %v2125_v55  ;;  %v2339_v60 = vcombine.high %v7334_v56, %v2125_v55 }
 0x36d   :  { %6151 = vpow2.f32 %v4096_v47  ;;  %v4126_v54 = vsel %vm4005_vm2, %v7624_v18, 0.0  ;;  %v2354_v39 = vcombine.low %v7332_v59, %v2133_v11  ;;  %v2355_v21 = vcombine.high %v7332_v59, %v2133_v11 }
 0x36e   :  { %6153 = vpow2.f32 %v4098_v22  ;;  %v2346_v12 = vrot.slane %v2338_v20, %v6510_v38 }
 0x36f   :  { %6155 = vpow2.f32 %v4100_v40  ;;  %v2107_v9 = vpop.permute.xlu0 %2106  ;;  %v2362_v22 = vrot.slane %v2354_v39, %v6510_v38 }
 0x370   :  { %v2115_v8 = vpop.permute.xlu1 %2114 }
 0x371   :  { %v2403_v11 = vcombine.high %v2346_v12, %v2362_v22 }
 0x372   :  { %4118 = vadd.xlane.f32.xlu1 %v4117_v15 }
 0x373   :  { %v2123_v13 = vpop.permute.xlu0 %2122  ;;  %v2417_v39 = vrot.slane %v2403_v11, %v6515_v45 }
 0x374   :  { %v2202_v40 = vcombine.low %v2107_v9, %v2123_v13 }
 0x376   :  { %4130 = vadd.xlane.f32.xlu1 %v4129_v44  ;;  %v2369_v44 = vrot.slane %v2355_v21, %v6510_v38 }
 0x379   :  { %v7626_v61 = vpop.eup %6149 }
 0x37a   :  { %v7628_v29 = vpop.eup %6151  ;;  %v4138_v37 = vsel %vm4005_vm2, %v7626_v61, 0.0  ;;  %4127 = vadd.xlane.f32.xlu1 %v4126_v54  ;;  %v2203_v54 = vcombine.high %v2107_v9, %v2123_v13 }
 0x37b   :  { %v7634_v62 = vpop.eup %6153  ;;  %4139 = vadd.xlane.f32.xlu0 %v4138_v37  ;;  %v4141_v52 = vsel %vm4005_vm2, %v7628_v29, 0.0  ;;  %v2353_v37 = vrot.slane %v2339_v60, %v6510_v38 }
 0x37c   :  { %v4144_v31 = vsel %vm4005_vm2, %v7634_v62, 0.0  ;;  %v7640_v33 = vpop.eup %6155 }
 0x37d   :  { %v4147_v53 = vsel %vm4005_vm2, %v7640_v33, 0.0  ;;  %v2418_v9 = vcombine.low %v2353_v37, %v2369_v44  ;;  %v2419_v13 = vcombine.high %v2353_v37, %v2369_v44 }
 0x37e   :  { %4145 = vadd.xlane.f32.xlu1 %v4144_v31 }
 0x37f   :  { %4142 = vadd.xlane.f32.xlu0 %v4141_v52  ;;  %v2426_v20 = vrot.slane %v2418_v9, %v6515_v45  ;;  %v2433_v21 = vrot.slane %v2419_v13, %v6515_v45 }
 0x382   :  { %4148 = vadd.xlane.f32.xlu1 %v4147_v53 }
 0x3c1   :  { %v4107_v7 = vpop.xlane.xlu0 %4106 }
 0x3c2   :  { %v4113_v28 = vpop.xlane.xlu1 %4112  ;;  %6157 = vrcp.f32 %v4107_v7 }
 0x3c6   :  { %v4104_v1 = vpop.xlane.xlu1 %4103 }
 0x3c7   :  { %6159 = vrcp.f32 %v4104_v1 }
 0x3c9   :  { %v4110_v63 = vpop.xlane.xlu0 %4109 }
 0x3ca   :  { %6161 = vrcp.f32 %v4110_v63  ;;  %v2131_v58 = vpop.permute.xlu1 %2130 }
 0x3cb   :  { %6163 = vrcp.f32 %v4113_v28  ;;  %v2218_v47 = vcombine.low %v2115_v8, %v2131_v58  ;;  %v2219_v24 = vcombine.high %v2115_v8, %v2131_v58  ;;  %v2210_v8 = vrot.slane %v2202_v40, %v6510_v38 }
 0x3cd   :  { %v2226_v31 = vrot.slane %v2218_v47, %v6510_v38  ;;  %v2233_v53 = vrot.slane %v2219_v24, %v6510_v38 }
 0x3cf   :  { %v6158_v34 = vpop.eup %6157  ;;  %v2266_v1 = vcombine.low %v2210_v8, %v2226_v31 }
 0x3d0   :  { %v4153_v59 = vmul.f32 %v6158_v34, %v7566_v0  ;;  %v2217_v0 = vrot.slane %v2203_v54, %v6510_v38 }
 0x3d1   :  { %v2274_v34 = vrot.slane %v2266_v1, %v6515_v45 }
 0x3d2   :  { %v2282_v63 = vcombine.low %v2217_v0, %v2233_v53  ;;  %v2283_v58 = vcombine.high %v2217_v0, %v2233_v53 }
 0x3d4   :  { %v6160_v36 = vpop.eup %6159 }
 0x3d5   :  { %v4151_v15 = vmul.f32 %v6160_v36, %v7575_v16  ;;  %v2402_v16 = vcombine.low %v2346_v12, %v2362_v22  ;;  %v2290_v36 = vrot.slane %v2282_v63, %v6515_v45  ;;  %v5636_v12 = vcombine.high %v2426_v20, %v2433_v21 }
 0x3d6   :  { %v4125_v52 = vpop.xlane.xlu0 %4124 }
 0x3d7   :  { %v6162_v56 = vpop.eup %6161  ;;  %6001 = vmatprep.mubr.msk.f32.mxu1 %vm4005_vm2, %v4151_v15 }
 0x3d8   :  { %6002 = vmatmul.mubr.msk.f32.vlgmr.msra.gmra.mxu1 %vm4005_vm2, %v4153_v59  ;;  %v4155_v55 = vmul.f32 %v6162_v56, %v7581_v49  ;;  %v6164_v7 = vpop.eup %6163  ;;  %v2267_v49 = vcombine.high %v2210_v8, %v2226_v31 }
 0x3d9   :  { %6005 = vmatpush3.msra.mxu1 %v7468_v46  ;;  %v2410_v46 = vrot.slane %v2402_v16, %v6515_v45 }
 0x3da   :  { %v4116_v28 = vpop.xlane.xlu0 %4115  ;;  %6006 = vmatprep.subr.mxu1 %v7450_v10  ;;  %6012 = vmatprep.mubr.msk.f32.mxu1 %vm4005_vm2, %v4155_v55  ;;  %v2281_v47 = vrot.slane %v2267_v49, %v6515_v45 }
 0x3db   :  { %6165 = vrcp.f32 %v4116_v28  ;;  %6007 = vmatpush3.msra.mxu1 %v7450_v10  ;;  %v4157_v10 = vmul.f32 %v6164_v7, %v7568_v2  ;;  %v5630_v24 = vcombine.low %v2410_v46, %v2417_v39  ;;  %v5632_v22 = vcombine.high %v2410_v46, %v2417_v39 }
 0x3dc   :  { %6008 = vmatprep.subr.mxu1 %v7326_v42  ;;  %6167 = vrcp.f32 %v4125_v52  ;;  %v5634_v2 = vcombine.low %v2426_v20, %v2433_v21  ;;  %v5624_v40 = vcombine.high %v2274_v34, %v2281_v47  ;;  %v2913_v52 = vrot.slane %v5636_v12, %v6510_v38 }
 0x3dd   :  { %6009 = vmatpush3.msra.mxu1 %v7326_v42  ;;  %v2297_v42 = vrot.slane %v2283_v58, %v6515_v45  ;;  %v2881_v37 = vrot.slane %v5632_v22, %v6510_v38 }
 0x3de   :  { %v4122_v60 = vpop.xlane.xlu0 %4121  ;;  %6010 = vmatprep.subr.mxu1 %v7368_v17  ;;  %v2897_v54 = vrot.slane %v5634_v2, %v6510_v38  ;;  %v2745_v56 = vrot.slane %v5624_v40, %v6510_v38 }
 0x3df   :  { %6169 = vrcp.f32 %v4122_v60  ;;  %6011 = vmatpush3.msra.mxu1 %v7368_v17  ;;  %v5622_v17 = vcombine.low %v2274_v34, %v2281_v47  ;;  %v5626_v15 = vcombine.low %v2290_v36, %v2297_v42  ;;  %v5628_v44 = vcombine.high %v2290_v36, %v2297_v42 }
 0x3e0   :  { %6013 = vmatmul.mubr.msk.f32.vlgmr.msra.gmra.mxu1 %vm4005_vm2, %v4157_v10  ;;  %6026 = vmatprep.subr.mxu1 %v7398_v32  ;;  %v2962_v16 = vcombine.low %v2897_v54, %v2913_v52 }
 0x3e1   :  { %6027 = vmatpush3.msra.mxu1 %v7398_v32  ;;  %v2865_v32 = vrot.slane %v5630_v24, %v6510_v38  ;;  %v2729_v59 = vrot.slane %v5622_v17, %v6510_v38  ;;  %v2777_v31 = vrot.slane %v5628_v44, %v6510_v38 }
 0x3e2   :  { %6028 = vmatprep.subr.mxu1 %v7452_v25  ;;  %v2970_v7 = vrot.slane %v2962_v16, %v6515_v45 }
 0x3e3   :  { %6029 = vmatpush3.msra.mxu1 %v7452_v25  ;;  %v2930_v55 = vcombine.low %v2865_v32, %v2881_v37  ;;  %v2931_v39 = vcombine.high %v2865_v32, %v2881_v37  ;;  %v2795_v60 = vcombine.high %v2729_v59, %v2745_v56 }
 0x3e4   :  { %6030 = vmatprep.subr.mxu1 %v7330_v43 }
 0x3e5   :  { %6031 = vmatpush3.msra.mxu1 %v7330_v43  ;;  %v2761_v43 = vrot.slane %v5626_v15, %v6510_v38  ;;  %v2938_v28 = vrot.slane %v2930_v55, %v6515_v45  ;;  %v2945_v42 = vrot.slane %v2931_v39, %v6515_v45  ;;  %v2809_v22 = vrot.slane %v2795_v60, %v6515_v45 }
 0x3e6   :  { %6032 = vmatprep.subr.mxu1 %v7382_v50 }
 0x3e7   :  { %6033 = vmatpush3.msra.mxu1 %v7382_v50  ;;  %v2794_v50 = vcombine.low %v2729_v59, %v2745_v56  ;;  %v2826_v9 = vcombine.low %v2761_v43, %v2777_v31  ;;  %v2827_v10 = vcombine.high %v2761_v43, %v2777_v31 }
 0x3e8   :  { %v6166_v25 = vpop.eup %6165  ;;  %6048 = vmatprep.subr.mxu1 %v7424_v5 }
 0x3e9   :  { %v4159_v53 = vmul.f32 %v6166_v25, %v7589_v35  ;;  %v6168_v11 = vpop.eup %6167  ;;  %v2802_v35 = vrot.slane %v2794_v50, %v6515_v45  ;;  %v2834_v49 = vrot.slane %v2826_v9, %v6515_v45  ;;  %v2841_v2 = vrot.slane %v2827_v10, %v6515_v45 }
 0x3ea   :  { %v4165_v0 = vmul.f32 %v6168_v11, %v7585_v41 }
 0x3eb   :  { %6023 = vmatprep.mubr.msk.f32.mxu0 %vm4005_vm2, %v4159_v53  ;;  %v2847_v63 = vcombine.high %v2802_v35, %v2834_v49  ;;  %v2849_v40 = vcombine.high %v2809_v22, %v2841_v2  ;;  %v2846_v32 = vcombine.low %v2802_v35, %v2834_v49 }
 0x3ec   :  { %v6170_v8 = vpop.eup %6169 }
 0x3ed   :  { %v4163_v13 = vmul.f32 %v6170_v8, %v7595_v19  ;;  %v2983_v19 = vcombine.high %v2938_v28, %v2970_v7 }
 0x3ef   :  { %6034 = vmatprep.mubr.msk.f32.mxu1 %vm4005_vm2, %v4163_v13 }
 0x3f0   :  { %v4137_v1 = vpop.xlane.xlu0 %4136  ;;  %6035 = vmatmul.mubr.msk.f32.vlgmr.msra.gmra.mxu1 %vm4005_vm2, %v4165_v0 }
 0x3f1   :  { %6049 = vmatpush3.msra.mxu1 %v7424_v5  ;;  %6171 = vrcp.f32 %v4137_v1  ;;  %v2963_v5 = vcombine.high %v2897_v54, %v2913_v52 }
 0x3f2   :  { %6050 = vmatprep.subr.mxu1 %v7480_v30 }
 0x3f3   :  { %6051 = vmatpush3.msra.mxu1 %v7480_v30  ;;  %v2977_v24 = vrot.slane %v2963_v5, %v6515_v45 }
 0x3f4   :  { %v4134_v41 = vpop.xlane.xlu0 %4133  ;;  %6052 = vmatprep.subr.mxu1 %v2983_v19 }
 0x3f5   :  { %6173 = vrcp.f32 %v4134_v41  ;;  %6053 = vmatpush3.msra.mxu1 %v2983_v19 }
 0x3f6   :  { %6054 = vmatprep.subr.mxu1 %v2847_v63 }
 0x3f7   :  { %6055 = vmatpush3.msra.mxu1 %v2847_v63 }
 0x3f8   :  { %6070 = vmatprep.subr.mxu1 %v7426_v51 }
 0x3fb   :  { %v4119_v58 = vpop.xlane.xlu1 %4118 }
 0x3fc   :  { %6175 = vrcp.f32 %v4119_v58 }
 0x3fe   :  { %v6172_v20 = vpop.eup %6171 }
 0x3ff   :  { %v4131_v46 = vpop.xlane.xlu1 %4130  ;;  %v4173_v36 = vmul.f32 %v6172_v20, %v7605_v27  ;;  %v2985_v27 = vcombine.high %v2945_v42, %v2977_v24 }
 0x400   :  { %6177 = vrcp.f32 %v4131_v46 }
 0x402   :  { %v6174_v21 = vpop.eup %6173 }
 0x403   :  { %v4171_v34 = vmul.f32 %v6174_v21, %v7611_v14  ;;  %v4128_v47 = vpop.xlane.xlu1 %4127 }
 0x404   :  { %v4140_v30 = vpop.xlane.xlu0 %4139 }
 0x405   :  { %6179 = vrcp.f32 %v4140_v30  ;;  %6056 = vmatprep.mubr.msk.f32.mxu1 %vm4005_vm2, %v4171_v34 }
 0x406   :  { %6181 = vrcp.f32 %v4128_v47  ;;  %6057 = vmatmul.mubr.msk.f32.vlgmr.msra.gmra.mxu1 %vm4005_vm2, %v4173_v36 }
 0x407   :  { %6071 = vmatpush3.msra.mxu1 %v7426_v51  ;;  %v4146_v14 = vpop.xlane.xlu1 %4145  ;;  %v2982_v51 = vcombine.low %v2938_v28, %v2970_v7 }
 0x408   :  { %6072 = vmatprep.subr.mxu1 %v7482_v23  ;;  %v4143_v12 = vpop.xlane.xlu0 %4142  ;;  %6183 = vrcp.f32 %v4146_v14 }
 0x409   :  { %v6176_v17 = vpop.eup %6175  ;;  %6073 = vmatpush3.msra.mxu1 %v7482_v23  ;;  %6185 = vrcp.f32 %v4143_v12 }
 0x40a   :  { %6074 = vmatprep.subr.mxu1 %v2985_v27  ;;  %v4161_v15 = vmul.f32 %v6176_v17, %v7616_v26 }
 0x40b   :  { %6075 = vmatpush3.msra.mxu1 %v2985_v27  ;;  %v4149_v44 = vpop.xlane.xlu1 %4148 }
 0x40c   :  { %6076 = vmatprep.subr.mxu1 %v2849_v40  ;;  %6187 = vrcp.f32 %v4149_v44  ;;  %6024 = vmatmul.mubr.msk.f32.vlgmr.msra.gmra.mxu0 %vm4005_vm2, %v4161_v15 }
 0x40d   :  { %6077 = vmatpush3.msra.mxu1 %v2849_v40  ;;  %6038 = vmatpush3.msra.mxu0 %v7472_v57  ;;  %v6178_v23 = vpop.eup %6177 }
 0x40e   :  { %6039 = vmatprep.subr.mxu0 %v7484_v6  ;;  %v4169_v52 = vmul.f32 %v6178_v23, %v7620_v4  ;;  %v2848_v4 = vcombine.low %v2809_v22, %v2841_v2 }
 0x40f   :  { %6040 = vmatpush3.msra.mxu0 %v7484_v6 }
 0x410   :  { %6041 = vmatprep.subr.mxu0 %v2982_v51 }
 0x411   :  { %6042 = vmatpush3.msra.mxu0 %v2982_v51 }
 0x412   :  { %v6180_v37 = vpop.eup %6179  ;;  %6043 = vmatprep.subr.mxu0 %v2846_v32 }
 0x413   :  { %v6182_v26 = vpop.eup %6181  ;;  %6044 = vmatpush3.msra.mxu0 %v2846_v32  ;;  %v4175_v57 = vmul.f32 %v6180_v37, %v7626_v61 }
 0x414   :  { %v4167_v54 = vmul.f32 %v6182_v26, %v7624_v18  ;;  %6059 = vmatprep.subr.mxu0 %v7428_v48  ;;  %v2984_v18 = vcombine.low %v2945_v42, %v2977_v24 }
 0x415   :  { %v6184_v25 = vpop.eup %6183 }
 0x416   :  { %6045 = vmatprep.mubr.msk.f32.mxu0 %vm4005_vm2, %v4167_v54  ;;  %v4179_v6 = vmul.f32 %v6184_v25, %v7634_v62  ;;  %v6186_v59 = vpop.eup %6185 }
 0x417   :  { %6046 = vmatmul.mubr.msk.f32.vlgmr.msra.gmra.mxu0 %vm4005_vm2, %v4169_v52 }
 0x418   :  { %6060 = vmatpush3.msra.mxu0 %v7428_v48  ;;  %6067 = vmatprep.mubr.msk.f32.mxu0 %vm4005_vm2, %v4175_v57  ;;  %v4177_v48 = vmul.f32 %v6186_v59, %v7628_v29 }
 0x419   :  { %6061 = vmatprep.subr.mxu0 %v7486_v3  ;;  %v6188_v56 = vpop.eup %6187  ;;  %6078 = vmatprep.mubr.msk.f32.mxu1 %vm4005_vm2, %v4179_v6 }
 0x41a   :  { %6062 = vmatpush3.msra.mxu0 %v7486_v3  ;;  %v4181_v61 = vmul.f32 %v6188_v56, %v7640_v33 }
 0x41b   :  { %6063 = vmatprep.subr.mxu0 %v2984_v18 }
 0x41c   :  { %6064 = vmatpush3.msra.mxu0 %v2984_v18  ;;  %6079 = vmatmul.mubr.msk.f32.vlgmr.msra.gmra.mxu1 %vm4005_vm2, %v4181_v61 }
 0x41d   :  { %6065 = vmatprep.subr.mxu0 %v2848_v4 }
 0x41e   :  { %6066 = vmatpush3.msra.mxu0 %v2848_v4 }
 0x41f   :  { %6068 = vmatmul.mubr.msk.f32.vlgmr.msra.gmra.mxu0 %vm4005_vm2, %v4177_v48 }
 0x498   :  { %v6003_v62 = vpop.f32.mrf.mxu1 }
 0x49a   :  { %v4254_v43 = vpop.f32.mrf.mxu1 }
 0x4a0   :  { %v6014_v31 = vpop.f32.mrf.mxu1 }
 0x4a2   :  { %v4335_v53 = vpop.f32.mrf.mxu1 }
 0x4b0   :  { %v6036_v3 = vpop.f32.mrf.mxu1 }
 0x4b1   :  { %v4982_v55 = vcombine.low %v6014_v31, %v6036_v3  ;;  %v4983_v16 = vcombine.high %v6014_v31, %v6036_v3 }
 0x4b2   :  { %v4497_v11 = vpop.f32.mrf.mxu1 }
 0x4b3   :  { %v4990_v9 = vrot.slane %v4982_v55, %v6510_v38  ;;  %v4997_v29 = vrot.slane %v4983_v16, %v6510_v38  ;;  %v4846_v13 = vcombine.low %v4335_v53, %v4497_v11  ;;  %v4847_v0 = vcombine.high %v4335_v53, %v4497_v11 }
 0x4b5   :  { %v4854_v46 = vrot.slane %v4846_v13, %v6510_v38  ;;  %v4861_v39 = vrot.slane %v4847_v0, %v6510_v38 }
 0x4c6   :  { %v6058_v12 = vpop.f32.mrf.mxu1 }
 0x4c8   :  { %v4659_v56 = vpop.f32.mrf.mxu1 }
 0x4cc   :  { %v6025_v8 = vpop.f32.mrf.mxu0 }
 0x4cd   :  { %v4966_v50 = vcombine.low %v6003_v62, %v6025_v8  ;;  %v4967_v33 = vcombine.high %v6003_v62, %v6025_v8 }
 0x4ce   :  { %v4416_v28 = vpop.f32.mrf.mxu0 }
 0x4cf   :  { %v4974_v7 = vrot.slane %v4966_v50, %v6510_v38  ;;  %v4981_v1 = vrot.slane %v4967_v33, %v6510_v38  ;;  %v4830_v35 = vcombine.low %v4254_v43, %v4416_v28  ;;  %v4831_v49 = vcombine.high %v4254_v43, %v4416_v28 }
 0x4d1   :  { %v5030_v19 = vcombine.low %v4974_v7, %v4990_v9  ;;  %v5031_v41 = vcombine.high %v4974_v7, %v4990_v9  ;;  %v5046_v63 = vcombine.low %v4981_v1, %v4997_v29  ;;  %v5047_v58 = vcombine.high %v4981_v1, %v4997_v29 }
 0x4d2   :  { %v4838_v5 = vrot.slane %v4830_v35, %v6510_v38  ;;  %v4845_v20 = vrot.slane %v4831_v49, %v6510_v38 }
 0x4d3   :  { %v5038_v21 = vrot.slane %v5030_v19, %v6515_v45  ;;  %v5045_v60 = vrot.slane %v5031_v41, %v6515_v45  ;;  %v5054_v10 = vrot.slane %v5046_v63, %v6515_v45  ;;  %v5061_v30 = vrot.slane %v5047_v58, %v6515_v45 }
 0x4d4   :  { %v4894_v34 = vcombine.low %v4838_v5, %v4854_v46  ;;  %v4895_v47 = vcombine.high %v4838_v5, %v4854_v46  ;;  %v4910_v36 = vcombine.low %v4845_v20, %v4861_v39  ;;  %v4911_v42 = vcombine.high %v4845_v20, %v4861_v39 }
 0x4d5   :  { %v5725_v24 = vcombine.low %v5038_v21, %v5045_v60  ;;  %v5727_v22 = vcombine.high %v5038_v21, %v5045_v60  ;;  %v5729_v2 = vcombine.low %v5054_v10, %v5061_v30  ;;  %v5731_v14 = vcombine.high %v5054_v10, %v5061_v30 }
 0x4d6   :  { %v4902_v27 = vrot.slane %v4894_v34, %v6515_v45  ;;  %v4909_v17 = vrot.slane %v4895_v47, %v6515_v45  ;;  %v4918_v40 = vrot.slane %v4910_v36, %v6515_v45  ;;  %v4925_v15 = vrot.slane %v4911_v42, %v6515_v45 }
 0x4d7   :  { %v5246_v44 = vrot.slane %v5725_v24, %v6510_v38  ;;  %v5262_v51 = vrot.slane %v5727_v22, %v6510_v38  ;;  %v5278_v23 = vrot.slane %v5729_v2, %v6510_v38  ;;  %v5294_v32 = vrot.slane %v5731_v14, %v6510_v38  ;;  %v6047_v57 = vpop.f32.mrf.mxu0 }
 0x4d8   :  { %v5717_v37 = vcombine.low %v4902_v27, %v4909_v17  ;;  %v5719_v26 = vcombine.high %v4902_v27, %v4909_v17  ;;  %v5721_v54 = vcombine.low %v4918_v40, %v4925_v15  ;;  %v5723_v52 = vcombine.high %v4918_v40, %v4925_v15 }
 0x4d9   :  { %v5302_v25 = vcombine.low %v5246_v44, %v5262_v51  ;;  %v5334_v6 = vcombine.low %v5278_v23, %v5294_v32  ;;  %v5303_v59 = vcombine.high %v5246_v44, %v5262_v51  ;;  %v5335_v18 = vcombine.high %v5278_v23, %v5294_v32  ;;  %v4578_v55 = vpop.f32.mrf.mxu0  ;;  %v5456_v51 = vld [vmem:[#allocation11 + $0x38] sm:$0xff] }
 0x4da   :  { %v5110_v4 = vrot.slane %v5717_v37, %v6510_v38  ;;  %v5126_v61 = vrot.slane %v5719_v26, %v6510_v38  ;;  %v5142_v48 = vrot.slane %v5721_v54, %v6510_v38  ;;  %v5158_v62 = vrot.slane %v5723_v52, %v6510_v38  ;;  %6081 = vmatprep.subr.mxu0 %v5456_v51 }
 0x4db   :  { %v7767_v43 = vrot.slane %v5302_v25, %v6515_v45  ;;  %v7770_v31 = vrot.slane %v5334_v6, %v6515_v45  ;;  %v7773_v53 = vrot.slane %v5303_v59, %v6515_v45  ;;  %v5349_v3 = vrot.slane %v5335_v18, %v6515_v45  ;;  %6082 = vmatpush3.msra.mxu0 %v5456_v51 }
 0x4dc   :  { %v6080_v16 = vpop.f32.mrf.mxu1  ;;  %v5166_v11 = vcombine.low %v5110_v4, %v5126_v61  ;;  %v5198_v8 = vcombine.low %v5142_v48, %v5158_v62  ;;  %v5167_v50 = vcombine.high %v5110_v4, %v5126_v61  ;;  %v5199_v33 = vcombine.high %v5142_v48, %v5158_v62  ;;  %v5455_v4 = vld [vmem:[#allocation11 + $0x30] sm:$0xff] }
 0x4dd   :  { %v5014_v9 = vcombine.low %v6058_v12, %v6080_v16  ;;  %v5015_v29 = vcombine.high %v6058_v12, %v6080_v16  ;;  %v5367_v13 = vcombine.high %v7767_v43, %v7770_v31  ;;  %v5368_v0 = vcombine.low %v7773_v53, %v5349_v3  ;;  %6083 = vmatprep.subr.mxu0 %v5455_v4 }
 0x4de   :  { %v4821_v7 = vpop.f32.mrf.mxu1  ;;  %v7780_v1 = vrot.slane %v5166_v11, %v6515_v45  ;;  %v7783_v35 = vrot.slane %v5198_v8, %v6515_v45  ;;  %v7786_v49 = vrot.slane %v5167_v50, %v6515_v45  ;;  %v7789_v19 = vrot.slane %v5199_v33, %v6515_v45  ;;  %v5454_v8 = vld [vmem:[#allocation11 + $0x28] sm:$0xff]  ;;  %6084 = vmatpush3.msra.mxu0 %v5455_v4 }
 0x4df   :  { %v6069_v28 = vpop.f32.mrf.mxu0  ;;  %v5022_v58 = vrot.slane %v5014_v9, %v6510_v38  ;;  %v5029_v46 = vrot.slane %v5015_v29, %v6510_v38  ;;  %5378 = vrot.lane.b32.xlu1 %v5367_v13, %s6342_s30  ;;  %v4878_v5 = vcombine.low %v4659_v56, %v4821_v7  ;;  %v4879_v20 = vcombine.high %v4659_v56, %v4821_v7 }
 0x4e0   :  { %v4998_v41 = vcombine.low %v6047_v57, %v6069_v28  ;;  %v4999_v63 = vcombine.high %v6047_v57, %v6069_v28  ;;  %v5231_v21 = vcombine.high %v7780_v1, %v7783_v35  ;;  %v5232_v60 = vcombine.low %v7786_v49, %v7789_v19  ;;  %v5453_v28 = vld [vmem:[#allocation11 + $0x20] sm:$0xff]  ;;  %6085 = vmatprep.subr.mxu0 %v5454_v8 }
 0x4e1   :  { %v4740_v39 = vpop.f32.mrf.mxu0  ;;  %v4886_v36 = vrot.slane %v4878_v5, %v6510_v38  ;;  %v4893_v42 = vrot.slane %v4879_v20, %v6510_v38  ;;  %v5369_v24 = vcombine.high %v7773_v53, %v5349_v3  ;;  %v5233_v22 = vcombine.high %v7786_v49, %v7789_v19  ;;  %6086 = vmatpush3.msra.mxu0 %v5454_v8 }
 0x4e2   :  { %v5006_v10 = vrot.slane %v4998_v41, %v6510_v38  ;;  %v5013_v30 = vrot.slane %v4999_v63, %v6510_v38  ;;  %v4862_v34 = vcombine.low %v4578_v55, %v4740_v39  ;;  %v4863_v47 = vcombine.high %v4578_v55, %v4740_v39  ;;  %5376 = vrot.lane.b32.xlu0 %v5231_v21, %s6342_s30 }
 0x4e3   :  { %5386 = vrot.lane.b32.xlu1 %v5368_v0, %s6357_s14  ;;  %v5366_v15 = vcombine.low %v7767_v43, %v7770_v31  ;;  %v5230_v44 = vcombine.low %v7780_v1, %v7783_v35  ;;  %6087 = vmatprep.subr.mxu0 %v5453_v28 }
 0x4e4   :  { %v5062_v2 = vcombine.low %v5006_v10, %v5022_v58  ;;  %v5063_v14 = vcombine.high %v5006_v10, %v5022_v58  ;;  %v5078_v12 = vcombine.low %v5013_v30, %v5029_v46  ;;  %v5079_v27 = vcombine.high %v5013_v30, %v5029_v46  ;;  %v5452_v46 = vld [vmem:[#allocation11 + $0x18] sm:$0xff]  ;;  %6088 = vmatpush3.msra.mxu0 %v5453_v28  ;;  %v5451_v10 = vld [vmem:[#allocation11 + $0x10] sm:$0xff] }
 0x4e5   :  { %v4870_v17 = vrot.slane %v4862_v34, %v6510_v38  ;;  %v4877_v40 = vrot.slane %v4863_v47, %v6510_v38  ;;  %6089 = vmatprep.subr.mxu0 %v5452_v46 }
 0x4e6   :  { %v5070_v23 = vrot.slane %v5062_v2, %v6515_v45  ;;  %v5077_v32 = vrot.slane %v5063_v14, %v6515_v45  ;;  %v5086_v37 = vrot.slane %v5078_v12, %v6515_v45  ;;  %v5093_v26 = vrot.slane %v5079_v27, %v6515_v45  ;;  %5384 = vrot.lane.b32.xlu0 %v5232_v60, %s6357_s14  ;;  %v5449_v14 = vld [vmem:[#allocation11] sm:$0xff] }
 0x4e7   :  { %v4926_v54 = vcombine.low %v4870_v17, %v4886_v36  ;;  %v4927_v52 = vcombine.high %v4870_v17, %v4886_v36  ;;  %v4942_v57 = vcombine.low %v4877_v40, %v4893_v42  ;;  %v4943_v25 = vcombine.high %v4877_v40, %v4893_v42  ;;  %5394 = vrot.lane.b32.xlu1 %v5369_v24, %s6358_s15 }
 0x4e8   :  { %v5726_v6 = vcombine.low %v5070_v23, %v5077_v32  ;;  %v5728_v59 = vcombine.high %v5070_v23, %v5077_v32  ;;  %v5730_v18 = vcombine.low %v5086_v37, %v5093_v26  ;;  %v5732_v56 = vcombine.high %v5086_v37, %v5093_v26  ;;  %6090 = vmatpush3.msra.mxu0 %v5452_v46 }
 0x4e9   :  { %v4934_v61 = vrot.slane %v4926_v54, %v6515_v45  ;;  %v4941_v48 = vrot.slane %v4927_v52, %v6515_v45  ;;  %v4950_v62 = vrot.slane %v4942_v57, %v6515_v45  ;;  %v4957_v53 = vrot.slane %v4943_v25, %v6515_v45  ;;  %6091 = vmatprep.subr.mxu0 %v5451_v10 }
 0x4ea   :  { %v5253_v3 = vrot.slane %v5726_v6, %v6510_v38  ;;  %v5269_v55 = vrot.slane %v5728_v59, %v6510_v38  ;;  %v5285_v16 = vrot.slane %v5730_v18, %v6510_v38  ;;  %v5301_v11 = vrot.slane %v5732_v56, %v6510_v38  ;;  %5392 = vrot.lane.b32.xlu0 %v5233_v22, %s6358_s15 }
 0x4eb   :  { %v5718_v50 = vcombine.low %v4934_v61, %v4941_v48  ;;  %v5720_v33 = vcombine.high %v4934_v61, %v4941_v48  ;;  %v5722_v9 = vcombine.low %v4950_v62, %v4957_v53  ;;  %v5724_v29 = vcombine.high %v4950_v62, %v4957_v53  ;;  %6092 = vmatpush3.msra.mxu0 %v5451_v10 }
 0x4ec   :  { %v5318_v13 = vcombine.low %v5253_v3, %v5269_v55  ;;  %v5350_v0 = vcombine.low %v5285_v16, %v5301_v11  ;;  %v5319_v21 = vcombine.high %v5253_v3, %v5269_v55  ;;  %v5351_v60 = vcombine.high %v5285_v16, %v5301_v11 }
 0x4ed   :  { %v5117_v7 = vrot.slane %v5718_v50, %v6510_v38  ;;  %v5133_v49 = vrot.slane %v5720_v33, %v6510_v38  ;;  %v5149_v19 = vrot.slane %v5722_v9, %v6510_v38  ;;  %v5165_v41 = vrot.slane %v5724_v29, %v6510_v38  ;;  %v5450_v38 = vld [vmem:[#allocation11 + $0x8] sm:$0xff]  ;;  %v5733_v33 = vld [vmem:[%s7865_s6] ss:$0 sm:$0xff] }
 0x4ee   :  { %v5326_v63 = vrot.slane %v5318_v13, %v6515_v45  ;;  %v5358_v58 = vrot.slane %v5350_v0, %v6515_v45  ;;  %v5333_v22 = vrot.slane %v5319_v21, %v6515_v45  ;;  %v5365_v2 = vrot.slane %v5351_v60, %v6515_v45  ;;  %6093 = vmatprep.subr.mxu0 %v5450_v38 }
 0x4ef   :  { %v5182_v39 = vcombine.low %v5117_v7, %v5133_v49  ;;  %v5214_v5 = vcombine.low %v5149_v19, %v5165_v41  ;;  %v5183_v36 = vcombine.high %v5117_v7, %v5133_v49  ;;  %v5215_v42 = vcombine.high %v5149_v19, %v5165_v41  ;;  %6094 = vmatpush3.msra.mxu0 %v5450_v38 }
 0x4f0   :  { %v5370_v20 = vcombine.low %v5326_v63, %v5358_v58  ;;  %v5371_v24 = vcombine.high %v5326_v63, %v5358_v58  ;;  %6095 = vmatprep.subr.mxu0 %v5449_v14  ;;  %v5372_v40 = vcombine.low %v5333_v22, %v5365_v2  ;;  %v5373_v23 = vcombine.high %v5333_v22, %v5365_v2 }
 0x4f1   :  { %v5190_v30 = vrot.slane %v5182_v39, %v6515_v45  ;;  %v5222_v34 = vrot.slane %v5214_v5, %v6515_v45  ;;  %v5197_v27 = vrot.slane %v5183_v36, %v6515_v45  ;;  %v5229_v17 = vrot.slane %v5215_v42, %v6515_v45  ;;  %6096 = vmatpush3.msra.mxu0 %v5449_v14 }
 0x4f2   :  { %5402 = vrot.lane.b32.xlu1 %v5370_v20, %s6359_s16 }
 0x4f3   :  { %v5234_v47 = vcombine.low %v5190_v30, %v5222_v34  ;;  %v5235_v12 = vcombine.high %v5190_v30, %v5222_v34  ;;  %v5236_v51 = vcombine.low %v5197_v27, %v5229_v17  ;;  %v5237_v32 = vcombine.high %v5197_v27, %v5229_v17 }
 0x4f5   :  { %5400 = vrot.lane.b32.xlu0 %v5234_v47, %s6359_s16 }
 0x4f6   :  { %5410 = vrot.lane.b32.xlu1 %v5371_v24, %s6360_s1 }
 0x4f9   :  { %5408 = vrot.lane.b32.xlu0 %v5235_v12, %s6360_s1 }
 0x4fa   :  { %5418 = vrot.lane.b32.xlu1 %v5372_v40, %s6361_s17 }
 0x4fd   :  { %5416 = vrot.lane.b32.xlu0 %v5236_v51, %s6361_s17 }
 0x4fe   :  { %5426 = vrot.lane.b32.xlu1 %v5373_v23, %s6362_s18 }
 0x501   :  { %5424 = vrot.lane.b32.xlu0 %v5237_v32, %s6362_s18 }
 0x551   :  { %v5379_v37 = vpop.permute.xlu1 %5378 }
 0x552   :  { %v5431_v61 = vsel %vm3260_vm1, %v5366_v15, %v5379_v37 }
 0x554   :  { %v5377_v26 = vpop.permute.xlu0 %5376 }
 0x555   :  { %v5387_v54 = vpop.permute.xlu1 %5386  ;;  %v5430_v4 = vsel %vm3260_vm1, %v5230_v44, %v5377_v26 }
 0x556   :  { %v5434_v53 = vsel %vm5432_vm3, %v5431_v61, %v5387_v54 }
 0x558   :  { %v5385_v52 = vpop.permute.xlu0 %5384 }
 0x559   :  { %v5395_v57 = vpop.permute.xlu1 %5394  ;;  %v5433_v48 = vsel %vm5432_vm3, %v5430_v4, %v5385_v52 }
 0x55a   :  { %v5437_v55 = vsel %vm5435_vm4, %v5434_v53, %v5395_v57 }
 0x55c   :  { %v5393_v25 = vpop.permute.xlu0 %5392 }
 0x55d   :  { %v5436_v3 = vsel %vm5435_vm4, %v5433_v48, %v5393_v25 }
 0x564   :  { %v5403_v45 = vpop.permute.xlu1 %5402 }
 0x565   :  { %v5439_v11 = vsel %vm4005_vm2, %v5437_v55, %v5403_v45 }
 0x567   :  { %v5401_v6 = vpop.permute.xlu0 %5400 }
 0x568   :  { %v5411_v59 = vpop.permute.xlu1 %5410  ;;  %v5438_v16 = vsel %vm4005_vm2, %v5436_v3, %v5401_v6 }
 0x569   :  { %v5442_v44 = vsel %vm5440_vm5, %v5439_v11, %v5411_v59 }
 0x56b   :  { %v5409_v18 = vpop.permute.xlu0 %5408 }
 0x56c   :  { %v5419_v56 = vpop.permute.xlu1 %5418  ;;  %v5441_v1 = vsel %vm5440_vm5, %v5438_v16, %v5409_v18 }
 0x56d   :  { %v5445_v43 = vsel %vm5443_vm6, %v5442_v44, %v5419_v56 }
 0x56f   :  { %v5417_v62 = vpop.permute.xlu0 %5416 }
 0x570   :  { %v5427_v35 = vpop.permute.xlu1 %5426  ;;  %v5444_v8 = vsel %vm5443_vm6, %v5441_v1, %v5417_v62 }
 0x571   :  { %v5448_v15 = vsel %vm5446_vm7, %v5445_v43, %v5427_v35 }
 0x573   :  { %v5425_v50 = vpop.permute.xlu0 %5424 }
 0x574   :  { %v5447_v31 = vsel %vm5446_vm7, %v5444_v8, %v5425_v50 }
 0x575   :  { %6097 = vmatprep.mubr.msk.f32.mxu0 %vm123_vm0, %v5447_v31 }
 0x576   :  { %6098 = vmatmul.mubr.msk.f32.vlgmr.msra.gmra.mxu0 %vm123_vm0, %v5448_v15 }
 0x636   :  { %v6099_v9 = vpop.f32.mrf.mxu0 }
 0x637   :  { %v5542_v29 = vadd.f32 %v6099_v9, %v5733_v33 }
 0x638   :  { %v5536_v13 = vpop.f32.mrf.mxu0 }
 0x639   :  { %5546 = vst.msk [vmem:[#allocation13 + $0x8] sm:$0xff] %vm123_vm0, %v5542_v29  ;;  %v5537_v0 = vadd.f32 %v5733_v33, %v5536_v13 }
 0x63b   :  { %5545 = vst.msk [vmem:[#allocation13] sm:$0xff] %vm123_vm0, %v5537_v0 }
 0x63c   :  { %6320 = shalt.err (!%p6317_p6)
}
 0x63d   :  { %5558 = dma.vmem_to_hbm [thread:$0]  %s5553_s21, 256, %s7866_s7, [#allocation4], %s6341_s29, %s6341_s29, %s6342_s30  }
 0x63e   :  { %6337 = dma.done.wait [#allocation4], 256  }
 0x63f   :  { %6338 = vsyncadd [#allocation4], 4294967040 }
 0x640   :  { %5562 = vsyncpa [#allocation3], 1 }
 0x641   :  { %5563 = vsyncpa [#allocation6], 1 }
 0x642   :  { %5564 = vsyncpa [#allocation9], 1 }
 0x643   :  { %5565 = vsyncpa [#allocation12], 1 }
 0x644   :  { %5566 = vsyncpa [#allocation4], 1 }

</bundles_post_ra>
